<compile_context>
chip_gen: v7x
topology: tpu7x:2x2x1
jax: 0.10.0
libtpu: 0.0.40
codegen_flags: <defaults>
</compile_context>

<pallas_src>
import functools

import jax
import jax.numpy as jnp
from jax.experimental import pallas as pl
from jax.experimental.pallas import tpu as pltpu


_LANE = 128

_ACTS = {
    "relu": lambda x: jnp.maximum(x, 0.0),
    "elu": lambda x: jnp.where(x > 0, x, jnp.expm1(x)),
    "leaky_relu": lambda x: jnp.where(x > 0, x, 0.01 * x),
    "tanh": jnp.tanh,
    "sigmoid": jax.nn.sigmoid,
    "silu": jax.nn.silu,
}


def _round_up(x, m):
    return (x + m - 1) // m * m


def _lane_pad(n):
    return _round_up(max(int(n), 1), _LANE)


def _num_tensorcores():
    """TensorCores sharing one JAX device's 'parallel' grid axis."""
    try:
        kind = jax.devices()[0].device_kind.lower()
    except Exception:  # defensive: unknown backend -> conservative
        return 1
    if "v5 lite" in kind or "v5e" in kind or "v6" in kind:
        return 1                      # single-TC chips
    if "v4" in kind or "v5" in kind or "v7" in kind:
        return 2                      # megacore (v4/v5p) or dual-TC (v7x)
    return 1


# ----------------------------------------------------------------------------
# Pallas kernel: 4-layer MLP (Linear + activation after EVERY layer, matching
# the PyTorch loop) applied to one tile of `tm` edge rows.  Weights (bf16) +
# biases (f32) live fully in VMEM; only the row dimension is tiled by the
# grid.  Matmul operands are bf16 with f32 MXU accumulation; all elementwise
# math stays f32 (v5e-safe); inter-layer storage is bf16.
# ----------------------------------------------------------------------------
def _edge_mlp_kernel(src_ref, dest_ref,
                     w0_ref, b0_ref, w1_ref, b1_ref,
                     w2_ref, b2_ref, w3_ref, b3_ref,
                     out_ref, *, act_fn):
    # Layer 0: one full-depth (K = 2*dim) MXU push.  The lane concatenation
    # runs on the XLU, which is otherwise idle in this kernel.
    x = jnp.concatenate([src_ref[...], dest_ref[...]], axis=-1).astype(jnp.bfloat16)
    h = jnp.dot(x, w0_ref[...], preferred_element_type=jnp.float32) + b0_ref[...]
    h = act_fn(h).astype(jnp.bfloat16)     # math in f32, store bf16

    h = jnp.dot(h, w1_ref[...], preferred_element_type=jnp.float32) + b1_ref[...]
    h = act_fn(h).astype(jnp.bfloat16)

    h = jnp.dot(h, w2_ref[...], preferred_element_type=jnp.float32) + b2_ref[...]
    h = act_fn(h).astype(jnp.bfloat16)

    h = jnp.dot(h, w3_ref[...], preferred_element_type=jnp.float32) + b3_ref[...]
    # PyTorch module applies the activation after the last Linear as well.
    # TODO(synk): lane-dense output packing (4 rows x dim_out -> 128 lanes) to
    # avoid masked vst on v5e; profiling-gated, leave as-is on v6e/v7x.
    out_ref[...] = act_fn(h).astype(out_ref.dtype)


# ----------------------------------------------------------------------------
# One-time parameter preparation (hoisted out of the per-call forward):
# weights -> bf16 [in, out] (MXU operands), biases -> f32 [1, out].
# ----------------------------------------------------------------------------
def prepare_edge_model_params(params):
    out = {}
    for i in range(4):
        out[f"w{i}"] = jnp.asarray(params[f"w{i}"], jnp.bfloat16)
        out[f"b{i}"] = jnp.asarray(params[f"b{i}"], jnp.float32).reshape(1, -1)
    return out


def edge_model_forward(src, dest, edges, globals_, batch, params,
                       act="relu", tm=2048):
    """Pallas implementation of EdgeModel.forward.

    src, dest : [E, dim] float32
    edges     : [E, 0]   float32 (zero-width; Linear(dim*2, 128) — see note)
    globals_, batch : unused (signature parity with the PyTorch module)
    params    : output of prepare_edge_model_params (bf16 weights [in,out],
                f32 biases [1,out]).  Raw f32 params are accepted but get
                converted on every call — prepare once instead.
    tm        : requested row tile (2048-4096 is the sweet spot).
    """
    del globals_, batch
    assert edges.shape[1] == 0, "edges must be zero-width (Linear(dim*2, 128))"
    E, dim = src.shape

    if params["w0"].dtype != jnp.bfloat16:
        params = prepare_edge_model_params(params)   # fallback; hoist this.

    w0, b0 = params["w0"], params["b0"]
    w1, b1 = params["w1"], params["b1"]
    w2, b2 = params["w2"], params["b2"]
    w3, b3 = params["w3"], params["b3"]
    assert w0.shape[0] == 2 * dim
    dim_out = w3.shape[1]

    # ---- row tiling ---------------------------------------------------------
    # Per-row VMEM footprint (lane-padded; inputs/outputs double-buffered).
    row_vmem = (2 * 2 * _lane_pad(dim) * 4          # src + dest tiles (f32)
                + 2 * _lane_pad(dim_out) * 4        # output tile (f32)
                + _lane_pad(128) * 4                # live f32 hidden
                + 2 * _lane_pad(128) * 2)           # live bf16 hiddens
    vmem_row_cap = max(512, ((24 << 20) // row_vmem) // 8 * 8)

    num_tc = _num_tensorcores()
    # Dual-TC chips: >= 2 pipelined steps per core so prologue/epilogue DMAs
    # overlap; single-TC chips: one full-extent block is allowed for small E.
    min_steps = 2 * num_tc if num_tc > 1 else 1
    tm_eff = min(tm, vmem_row_cap, max(pl.cdiv(E, min_steps), 8))
    if tm_eff >= E:
        tm_eff = E                                   # full-extent block, always legal
    else:
        tm_eff = max(8, _round_up(tm_eff, 8))        # sublane-aligned partial blocks

    if num_tc > 1 and tm_eff < E:
        # Best-effort: keep the total step count a multiple of the TC count so
        # both TensorCores get balanced work.
        steps = pl.cdiv(E, tm_eff)
        if steps % num_tc != 0:
            steps = _round_up(steps, num_tc)
            tm_eff = max(8, _round_up(pl.cdiv(E, steps), 8))

    grid = (pl.cdiv(E, tm_eff),)   # ragged last block handled by clipped DMAs

    # ---- VMEM limit + cost estimate ----------------------------------------
    weight_bytes = sum(int(a.size) * a.dtype.itemsize
                       for a in (w0, b0, w1, b1, w2, b2, w3, b3))
    vmem_est = tm_eff * row_vmem + 2 * weight_bytes + (2 << 20)
    vmem_limit = int(min(max(2 * vmem_est, 32 << 20), 48 << 20))

    flops = 2 * E * (2 * dim * 128 + 128 * 128 + 128 * 64 + 64 * dim_out)
    transcendentals = 0 if act == "relu" else E * (128 + 128 + 64 + dim_out)
    bytes_accessed = E * (2 * dim + dim_out) * 4 + weight_bytes
    cost = pl.CostEstimate(flops=flops, transcendentals=transcendentals,
                           bytes_accessed=bytes_accessed)

    # Constant-index weight/bias specs (re-DMA across grid steps is elided).
    full = lambda a: pl.BlockSpec(a.shape, lambda i: (0, 0))
    kernel = functools.partial(_edge_mlp_kernel, act_fn=_ACTS[act])

    return pl.pallas_call(
        kernel,
        out_shape=jax.ShapeDtypeStruct((E, dim_out), jnp.float32),
        grid=grid,
        in_specs=[
            pl.BlockSpec((tm_eff, dim), lambda i: (i, 0)),   # src rows
            pl.BlockSpec((tm_eff, dim), lambda i: (i, 0)),   # dest rows
            full(w0), full(b0), full(w1), full(b1),
            full(w2), full(b2), full(w3), full(b3),
        ],
        out_specs=pl.BlockSpec((tm_eff, dim_out), lambda i: (i, 0)),
        compiler_params=pltpu.CompilerParams(
            dimension_semantics=("parallel",),
            vmem_limit_bytes=vmem_limit),
        cost_estimate=cost,
    )(src, dest, w0, b0, w1, b1, w2, b2, w3, b3)


# ----------------------------------------------------------------------------
# Deterministic parameter construction (mirrors nn.Linear default init:
# U(-1/sqrt(fan_in), 1/sqrt(fan_in))).  Weights stored as [in, out] so the
# kernel computes x @ W + b (== PyTorch x @ W.T + b with W:[out, in]).
# ----------------------------------------------------------------------------
def init_edge_model_params(key, dim):
    sizes = [(dim * 2, 128), (128, 128), (128, 64), (64, dim)]
    params = {}
    for i, (fan_in, fan_out) in enumerate(sizes):
        key, kw, kb = jax.random.split(key, 3)
        bound = 1.0 / jnp.sqrt(float(fan_in))
        params[f"w{i}"] = jax.random.uniform(
            kw, (fan_in, fan_out), jnp.float32, -bound, bound)
        params[f"b{i}"] = jax.random.uniform(
            kb, (1, fan_out), jnp.float32, -bound, bound)
    return params


def _reference_forward(src, dest, edges, params, act="relu"):
    """Pure-JAX reference using the same bf16-operand / f32-accumulate math."""
    act_fn = _ACTS[act]
    h = jnp.concatenate([src, dest, edges], axis=1)
    for i in range(4):
        w = jnp.asarray(params[f"w{i}"], jnp.bfloat16)
        b = jnp.asarray(params[f"b{i}"], jnp.float32)
        h = act_fn(jnp.dot(h.astype(jnp.bfloat16), w,
                           preferred_element_type=jnp.float32) + b)
    return h


def _reference_forward_f32(src, dest, edges, params, act="relu"):
    """Full-f32 reference (sanity check for bf16 numerics)."""
    act_fn = _ACTS[act]
    h = jnp.concatenate([src, dest, edges], axis=1)
    for i in range(4):
        h = act_fn(h @ params[f"w{i}"] + params[f"b{i}"])
    return h


if __name__ == "__main__":
    dim = 32           # node feature dim (module's `dim`)
    E = 300            # number of edges (small, non-tile-multiple example)
    act = "relu"

    key = jax.random.PRNGKey(0)
    key, ks, kd = jax.random.split(key, 3)
    src = jax.random.normal(ks, (E, dim), jnp.float32)
    dest = jax.random.normal(kd, (E, dim), jnp.float32)
    edges = jnp.zeros((E, 0), jnp.float32)       # zero-width edge features
    globals_ = jnp.zeros((1, dim), jnp.float32)  # unused by forward
    batch = jnp.zeros((E,), jnp.int32)           # unused by forward

    raw_params = init_edge_model_params(key, dim)
    params = prepare_edge_model_params(raw_params)   # one-time (hoisted)

    out = edge_model_forward(src, dest, edges, globals_, batch, params, act=act)
    out = jax.block_until_ready(out)
    assert out.shape == (E, dim)

    # Tight check against a bf16-matched reference.
    ref = _reference_forward(src, dest, edges, raw_params, act=act)
    assert jnp.allclose(out, ref, atol=2e-3, rtol=2e-3), "mismatch vs bf16 reference"

    # Loose sanity check against the full-f32 reference (bf16 operand error).
    ref32 = _reference_forward_f32(src, dest, edges, raw_params, act=act)
    assert jnp.allclose(out, ref32, atol=5e-2, rtol=5e-2), "mismatch vs f32 reference"

    print("KERNEL_OK")
</pallas_src>

<mosaic_0001>
module attributes {stable_mosaic.version = 11 : i64} {
  func.func @_edge_mlp_kernel(%arg0: i32, %arg1: memref<300x32xf32, #tpu.memory_space<vmem>>, %arg2: memref<300x32xf32, #tpu.memory_space<vmem>>, %arg3: memref<64x128xbf16, #tpu.memory_space<vmem>>, %arg4: memref<1x128xf32, #tpu.memory_space<vmem>>, %arg5: memref<128x128xbf16, #tpu.memory_space<vmem>>, %arg6: memref<1x128xf32, #tpu.memory_space<vmem>>, %arg7: memref<128x64xbf16, #tpu.memory_space<vmem>>, %arg8: memref<1x64xf32, #tpu.memory_space<vmem>>, %arg9: memref<64x32xbf16, #tpu.memory_space<vmem>>, %arg10: memref<1x32xf32, #tpu.memory_space<vmem>>, %arg11: memref<300x32xf32, #tpu.memory_space<vmem>>) attributes {dimension_semantics = [#tpu.dimension_semantics<parallel>], iteration_bounds = array<i64: 1>, scalar_prefetch = 0 : i64, scratch_operands = 0 : i64, tpu.core_type = #tpu.core_type<tc>, window_params = [{transform_indices = @transform_0, window_bounds = array<i64: 300, 32>}, {transform_indices = @transform_1, window_bounds = array<i64: 300, 32>}, {pipeline_mode = #tpu.pipeline_mode<synchronous>, transform_indices = @transform_2, window_bounds = array<i64: 64, 128>}, {pipeline_mode = #tpu.pipeline_mode<synchronous>, transform_indices = @transform_3, window_bounds = array<i64: 1, 128>}, {pipeline_mode = #tpu.pipeline_mode<synchronous>, transform_indices = @transform_4, window_bounds = array<i64: 128, 128>}, {pipeline_mode = #tpu.pipeline_mode<synchronous>, transform_indices = @transform_5, window_bounds = array<i64: 1, 128>}, {pipeline_mode = #tpu.pipeline_mode<synchronous>, transform_indices = @transform_6, window_bounds = array<i64: 128, 64>}, {pipeline_mode = #tpu.pipeline_mode<synchronous>, transform_indices = @transform_7, window_bounds = array<i64: 1, 64>}, {pipeline_mode = #tpu.pipeline_mode<synchronous>, transform_indices = @transform_8, window_bounds = array<i64: 64, 32>}, {pipeline_mode = #tpu.pipeline_mode<synchronous>, transform_indices = @transform_9, window_bounds = array<i64: 1, 32>}, {transform_indices = @transform_10, window_bounds = array<i64: 300, 32>}]} {
    %c0 = arith.constant 0 : index
    %c0_0 = arith.constant 0 : index
    %0 = vector.load %arg1[%c0, %c0_0] : memref<300x32xf32, #tpu.memory_space<vmem>>, vector<300x32xf32>
    %c0_1 = arith.constant 0 : index
    %c0_2 = arith.constant 0 : index
    %1 = vector.load %arg2[%c0_1, %c0_2] : memref<300x32xf32, #tpu.memory_space<vmem>>, vector<300x32xf32>
    %2 = tpu.concatenate %0, %1 in 1 : vector<300x32xf32>, vector<300x32xf32> -> vector<300x64xf32>
    %3 = arith.truncf %2 : vector<300x64xf32> to vector<300x64xbf16>
    %c0_3 = arith.constant 0 : index
    %c0_4 = arith.constant 0 : index
    %4 = vector.load %arg3[%c0_3, %c0_4] : memref<64x128xbf16, #tpu.memory_space<vmem>>, vector<64x128xbf16>
    %cst = arith.constant dense<0.000000e+00> : vector<300x128xf32>
    %5 = tpu.matmul %3, %4, %cst {dimension_numbers = #tpu.dot_dimension_numbers<[1], [0], [0], [1], [0, 0, 1, 1], [], []>} : vector<300x64xbf16>, vector<64x128xbf16>, vector<300x128xf32> -> vector<300x128xf32>
    %c0_5 = arith.constant 0 : index
    %c0_6 = arith.constant 0 : index
    %6 = vector.load %arg4[%c0_5, %c0_6] : memref<1x128xf32, #tpu.memory_space<vmem>>, vector<1x128xf32>
    %7 = vector.broadcast %6 : vector<1x128xf32> to vector<300x128xf32>
    %8 = arith.addf %5, %7 : vector<300x128xf32>
    %cst_7 = arith.constant 0.000000e+00 : f32
    %9 = vector.broadcast %cst_7 : f32 to vector<300x128xf32>
    %10 = arith.maximumf %8, %9 : vector<300x128xf32>
    %11 = arith.truncf %10 : vector<300x128xf32> to vector<300x128xbf16>
    %c0_8 = arith.constant 0 : index
    %c0_9 = arith.constant 0 : index
    %12 = vector.load %arg5[%c0_8, %c0_9] : memref<128x128xbf16, #tpu.memory_space<vmem>>, vector<128x128xbf16>
    %cst_10 = arith.constant dense<0.000000e+00> : vector<300x128xf32>
    %13 = tpu.matmul %11, %12, %cst_10 {dimension_numbers = #tpu.dot_dimension_numbers<[1], [0], [0], [1], [0, 0, 1, 1], [], []>} : vector<300x128xbf16>, vector<128x128xbf16>, vector<300x128xf32> -> vector<300x128xf32>
    %c0_11 = arith.constant 0 : index
    %c0_12 = arith.constant 0 : index
    %14 = vector.load %arg6[%c0_11, %c0_12] : memref<1x128xf32, #tpu.memory_space<vmem>>, vector<1x128xf32>
    %15 = vector.broadcast %14 : vector<1x128xf32> to vector<300x128xf32>
    %16 = arith.addf %13, %15 : vector<300x128xf32>
    %cst_13 = arith.constant 0.000000e+00 : f32
    %17 = vector.broadcast %cst_13 : f32 to vector<300x128xf32>
    %18 = arith.maximumf %16, %17 : vector<300x128xf32>
    %19 = arith.truncf %18 : vector<300x128xf32> to vector<300x128xbf16>
    %c0_14 = arith.constant 0 : index
    %c0_15 = arith.constant 0 : index
    %20 = vector.load %arg7[%c0_14, %c0_15] : memref<128x64xbf16, #tpu.memory_space<vmem>>, vector<128x64xbf16>
    %cst_16 = arith.constant dense<0.000000e+00> : vector<300x64xf32>
    %21 = tpu.matmul %19, %20, %cst_16 {dimension_numbers = #tpu.dot_dimension_numbers<[1], [0], [0], [1], [0, 0, 1, 1], [], []>} : vector<300x128xbf16>, vector<128x64xbf16>, vector<300x64xf32> -> vector<300x64xf32>
    %c0_17 = arith.constant 0 : index
    %c0_18 = arith.constant 0 : index
    %22 = vector.load %arg8[%c0_17, %c0_18] : memref<1x64xf32, #tpu.memory_space<vmem>>, vector<1x64xf32>
    %23 = vector.broadcast %22 : vector<1x64xf32> to vector<300x64xf32>
    %24 = arith.addf %21, %23 : vector<300x64xf32>
    %cst_19 = arith.constant 0.000000e+00 : f32
    %25 = vector.broadcast %cst_19 : f32 to vector<300x64xf32>
    %26 = arith.maximumf %24, %25 : vector<300x64xf32>
    %27 = arith.truncf %26 : vector<300x64xf32> to vector<300x64xbf16>
    %c0_20 = arith.constant 0 : index
    %c0_21 = arith.constant 0 : index
    %28 = vector.load %arg9[%c0_20, %c0_21] : memref<64x32xbf16, #tpu.memory_space<vmem>>, vector<64x32xbf16>
    %cst_22 = arith.constant dense<0.000000e+00> : vector<300x32xf32>
    %29 = tpu.matmul %27, %28, %cst_22 {dimension_numbers = #tpu.dot_dimension_numbers<[1], [0], [0], [1], [0, 0, 1, 1], [], []>} : vector<300x64xbf16>, vector<64x32xbf16>, vector<300x32xf32> -> vector<300x32xf32>
    %c0_23 = arith.constant 0 : index
    %c0_24 = arith.constant 0 : index
    %30 = vector.load %arg10[%c0_23, %c0_24] : memref<1x32xf32, #tpu.memory_space<vmem>>, vector<1x32xf32>
    %31 = vector.broadcast %30 : vector<1x32xf32> to vector<300x32xf32>
    %32 = arith.addf %29, %31 : vector<300x32xf32>
    %cst_25 = arith.constant 0.000000e+00 : f32
    %33 = vector.broadcast %cst_25 : f32 to vector<300x32xf32>
    %34 = arith.maximumf %32, %33 : vector<300x32xf32>
    %c0_26 = arith.constant 0 : index
    %c0_27 = arith.constant 0 : index
    %35 = vector.load %arg11[%c0_26, %c0_27] : memref<300x32xf32, #tpu.memory_space<vmem>>, vector<300x32xf32>
    tpu.vector_store %arg11[%c0_26, %c0_27], %34 {strides = array<i32>} : memref<300x32xf32, #tpu.memory_space<vmem>>, vector<300x32xf32>,
    return
  }
  func.func @transform_0(%arg0: i32) -> (i32, i32) {
    %c0_i32 = arith.constant 0 : i32
    %c0_i32_0 = arith.constant 0 : i32
    return %arg0, %c0_i32 : i32, i32
  }
  func.func @transform_1(%arg0: i32) -> (i32, i32) {
    %c0_i32 = arith.constant 0 : i32
    %c0_i32_0 = arith.constant 0 : i32
    return %arg0, %c0_i32 : i32, i32
  }
  func.func @transform_2(%arg0: i32) -> (i32, i32) {
    %c0_i32 = arith.constant 0 : i32
    %c0_i32_0 = arith.constant 0 : i32
    %c0_i32_1 = arith.constant 0 : i32
    return %c0_i32, %c0_i32_0 : i32, i32
  }
  func.func @transform_3(%arg0: i32) -> (i32, i32) {
    %c0_i32 = arith.constant 0 : i32
    %c0_i32_0 = arith.constant 0 : i32
    %c0_i32_1 = arith.constant 0 : i32
    return %c0_i32, %c0_i32_0 : i32, i32
  }
  func.func @transform_4(%arg0: i32) -> (i32, i32) {
    %c0_i32 = arith.constant 0 : i32
    %c0_i32_0 = arith.constant 0 : i32
    %c0_i32_1 = arith.constant 0 : i32
    return %c0_i32, %c0_i32_0 : i32, i32
  }
  func.func @transform_5(%arg0: i32) -> (i32, i32) {
    %c0_i32 = arith.constant 0 : i32
    %c0_i32_0 = arith.constant 0 : i32
    %c0_i32_1 = arith.constant 0 : i32
    return %c0_i32, %c0_i32_0 : i32, i32
  }
  func.func @transform_6(%arg0: i32) -> (i32, i32) {
    %c0_i32 = arith.constant 0 : i32
    %c0_i32_0 = arith.constant 0 : i32
    %c0_i32_1 = arith.constant 0 : i32
    return %c0_i32, %c0_i32_0 : i32, i32
  }
  func.func @transform_7(%arg0: i32) -> (i32, i32) {
    %c0_i32 = arith.constant 0 : i32
    %c0_i32_0 = arith.constant 0 : i32
    %c0_i32_1 = arith.constant 0 : i32
    return %c0_i32, %c0_i32_0 : i32, i32
  }
  func.func @transform_8(%arg0: i32) -> (i32, i32) {
    %c0_i32 = arith.constant 0 : i32
    %c0_i32_0 = arith.constant 0 : i32
    %c0_i32_1 = arith.constant 0 : i32
    return %c0_i32, %c0_i32_0 : i32, i32
  }
  func.func @transform_9(%arg0: i32) -> (i32, i32) {
    %c0_i32 = arith.constant 0 : i32
    %c0_i32_0 = arith.constant 0 : i32
    %c0_i32_1 = arith.constant 0 : i32
    return %c0_i32, %c0_i32_0 : i32, i32
  }
  func.func @transform_10(%arg0: i32) -> (i32, i32) {
    %c0_i32 = arith.constant 0 : i32
    %c0_i32_0 = arith.constant 0 : i32
    return %arg0, %c0_i32 : i32, i32
  }
}

</mosaic_0001>

<bundles_post_ra>
// kernel: tpu_custom_call.1
= control target key start
LH: loop header
LB: loop body
LE: loop exit
PB: predicated region body
PF: predicated region fallthrough
CT: control target
= control target key end

     0   :  { %v2297_v3 = vmov 0.0   ;;  %vm2298_vm0 = vmmov 0   ;;  %s2299_s29 = smov 32   ;;  %vm264_vm1 = vcmask 261120   ;;  %vm361_vm2 = vcmask 523264   ;;  %s3253_s1 = inlined_call_operand.vmem [shape: f32[300,32], index: 1, kind: input, shape index: {}]   ;;  %s3254_s2 = inlined_call_operand.vmem [shape: bf16[64,128], index: 2, kind: input, shape index: {}]   ;;  %s3255_s0 = inlined_call_operand.vmem [shape: f32[300,32], index: 0, kind: input, shape index: {}]   ;;  %s3256_s4 = inlined_call_operand.vmem [shape: bf16[128,128], index: 4, kind: input, shape index: {}]   ;;  %s3257_s6 = inlined_call_operand.vmem [shape: bf16[128,64], index: 6, kind: input, shape index: {}]   ;;  %s3258_s3 = inlined_call_operand.vmem [shape: f32[1,128], index: 3, kind: input, shape index: {}]   ;;  %s3259_s8 = inlined_call_operand.vmem [shape: bf16[64,32], index: 8, kind: input, shape index: {}]   ;;  %s3260_s5 = inlined_call_operand.vmem [shape: f32[1,128], index: 5, kind: input, shape index: {}]   ;;  %s3261_s7 = inlined_call_operand.vmem [shape: f32[1,64], index: 7, kind: input, shape index: {}]   ;;  %s3262_s9 = inlined_call_operand.vmem [shape: f32[1,32], index: 9, kind: input, shape index: {}]   ;;  %s3263_s10 = inlined_call_operand.vmem [shape: f32[300,32], index: 10, kind: output, shape index: {}]  }
   0x1   :  { %v74_v0 = vld [vmem:[%s3253_s1] sm:$0xff]  ;;  %v75_v1 = vld [vmem:[%s3253_s1 + $0x8] sm:$0xff]  ;;  %v76_v2 = vld [vmem:[%s3253_s1 + $0x10] sm:$0xff]  ;;  %1815 = vmatprep.subr.bf16.mxu0 %v2297_v3  ;;  %1823 = vmatprep.mubr.msk.bf16.mxu0 %vm2298_vm0, %v2297_v3  ;;  %vm1643_vm3 = vcmask 257024  }
   0x2   :  { %v2178_v4 = vpack.i.bf16 %v75_v1, %v74_v0  ;;  %v77_v5 = vld [vmem:[%s3253_s1 + $0x18] sm:$0xff]  ;;  %v78_v6 = vld [vmem:[%s3253_s1 + $0x20] sm:$0xff]  ;;  %v79_v7 = vld [vmem:[%s3253_s1 + $0x28] sm:$0xff]  ;;  %1899 = vmatprep.subr.bf16.mxu1 %v2297_v3  ;;  %1915 = vmatprep.mubr.msk.bf16.mxu1 %vm2298_vm0, %v2297_v3 }
   0x3   :  { %v2188_v8 = vpack.i.bf16 %v79_v7, %v78_v6  ;;  %v80_v9 = vld [vmem:[%s3253_s1 + $0x30] sm:$0xff]  ;;  %v81_v10 = vld [vmem:[%s3253_s1 + $0x38] sm:$0xff]  ;;  %v2183_v11 = vpack.i.bf16 %v77_v5, %v76_v2  ;;  %v82_v13 = vld [vmem:[%s3253_s1 + $0x40] sm:$0xff] }
   0x4   :  { %2179 = vrot.lane.b32.xlu0 %v2178_v4, %s2299_s29  ;;  %v2193_v12 = vpack.i.bf16 %v81_v10, %v80_v9  ;;  %v83_v14 = vld [vmem:[%s3253_s1 + $0x48] sm:$0xff]  ;;  %v84_v15 = vld [vmem:[%s3253_s1 + $0x50] sm:$0xff]  ;;  %v85_v16 = vld [vmem:[%s3253_s1 + $0x58] sm:$0xff] }
   0x5   :  { %2189 = vrot.lane.b32.xlu1 %v2188_v8, %s2299_s29  ;;  %v2198_v17 = vpack.i.bf16 %v83_v14, %v82_v13  ;;  %v2203_v18 = vpack.i.bf16 %v85_v16, %v84_v15  ;;  %v86_v19 = vld [vmem:[%s3253_s1 + $0x60] sm:$0xff]  ;;  %v87_v20 = vld [vmem:[%s3253_s1 + $0x68] sm:$0xff]  ;;  %v88_v21 = vld [vmem:[%s3253_s1 + $0x70] sm:$0xff] }
   0x6   :  { %v89_v22 = vld [vmem:[%s3253_s1 + $0x78] sm:$0xff]  ;;  %v2273_v23 = vld [vmem:[%s3254_s2] sm:$0xff]   ;;  %v2208_v24 = vpack.i.bf16 %v87_v20, %v86_v19  ;;  %v91_v26 = vld [vmem:[%s3253_s1 + $0x88] sm:$0xff] }
   0x7   :  { %v90_v25 = vld [vmem:[%s3253_s1 + $0x80] sm:$0xff]  ;;  %v2213_v27 = vpack.i.bf16 %v89_v22, %v88_v21  ;;  %1816 = vmatpush3.bf16.msra.mxu0 %v2273_v23  ;;  %v2274_v28 = vld [vmem:[%s3254_s2 + $0x8] sm:$0xff]   ;;  %v92_v29 = vld [vmem:[%s3253_s1 + $0x90] sm:$0xff] }
   0x8   :  { %2184 = vrot.lane.b32.xlu0 %v2183_v11, %s2299_s29  ;;  %v93_v30 = vld [vmem:[%s3253_s1 + $0x98] sm:$0xff]  ;;  %1817 = vmatprep.subr.bf16.mxu0 %v2297_v3  ;;  %v2218_v31 = vpack.i.bf16 %v91_v26, %v90_v25  ;;  %v94_v33 = vld [vmem:[%s3253_s1 + $0xa0] sm:$0xff]  ;;  %v95_v34 = vld [vmem:[%s3253_s1 + $0xa8] sm:$0xff] }
   0x9   :  { %2194 = vrot.lane.b32.xlu1 %v2193_v12, %s2299_s29  ;;  %v2223_v32 = vpack.i.bf16 %v93_v30, %v92_v29  ;;  %v2275_v35 = vld [vmem:[%s3254_s2 + $0x10] sm:$0xff]   ;;  %v97_v37 = vld [vmem:[%s3253_s1 + $0xb8] sm:$0xff]  ;;  %v2228_v38 = vpack.i.bf16 %v95_v34, %v94_v33  ;;  %v98_v40 = vld [vmem:[%s3253_s1 + $0xc0] sm:$0xff] }
   0xa   :  { %v96_v36 = vld [vmem:[%s3253_s1 + $0xb0] sm:$0xff]  ;;  %v99_v41 = vld [vmem:[%s3253_s1 + $0xc8] sm:$0xff]  ;;  %v2276_v42 = vld [vmem:[%s3254_s2 + $0x18] sm:$0xff]  }
   0xb   :  { %1818 = vmatpush3.bf16.msra.mxu0 %v2274_v28  ;;  %v2233_v39 = vpack.i.bf16 %v97_v37, %v96_v36  ;;  %v100_v43 = vld [vmem:[%s3253_s1 + $0xd0] sm:$0xff]  ;;  %v101_v44 = vld [vmem:[%s3253_s1 + $0xd8] sm:$0xff]  ;;  %v2238_v45 = vpack.i.bf16 %v99_v41, %v98_v40  ;;  %v102_v47 = vld [vmem:[%s3253_s1 + $0xe0] sm:$0xff] }
   0xc   :  { %2199 = vrot.lane.b32.xlu0 %v2198_v17, %s2299_s29  ;;  %1819 = vmatprep.subr.bf16.mxu0 %v2297_v3  ;;  %v2243_v46 = vpack.i.bf16 %v101_v44, %v100_v43  ;;  %v103_v48 = vld [vmem:[%s3253_s1 + $0xe8] sm:$0xff]  ;;  %v104_v49 = vld [vmem:[%s3253_s1 + $0xf0] sm:$0xff]  ;;  %v105_v50 = vld [vmem:[%s3253_s1 + $0xf8] sm:$0xff] }
   0xd   :  { %2204 = vrot.lane.b32.xlu1 %v2203_v18, %s2299_s29  ;;  %v2248_v51 = vpack.i.bf16 %v103_v48, %v102_v47  ;;  %v2253_v52 = vpack.i.bf16 %v105_v50, %v104_v49  ;;  %v106_v53 = vld [vmem:[%s3253_s1 + $0x100] sm:$0xff]  ;;  %v107_v54 = vld [vmem:[%s3253_s1 + $0x108] sm:$0xff]  ;;  %v108_v55 = vld [vmem:[%s3253_s1 + $0x110] sm:$0xff] }
   0xe   :  { %v109_v56 = vld [vmem:[%s3253_s1 + $0x118] sm:$0xff]  ;;  %v2258_v57 = vpack.i.bf16 %v107_v54, %v106_v53  ;;  %v110_v59 = vld [vmem:[%s3253_s1 + $0x120] sm:$0xff]  ;;  %v111_v60 = vld [vmem:[%s3253_s1 + $0x128] sm:$0xf] }
   0xf   :  { %1820 = vmatpush3.bf16.msra.mxu0 %v2275_v35  ;;  %v2263_v58 = vpack.i.bf16 %v109_v56, %v108_v55  ;;  %v2268_v61 = vpack.i.bf16 %v111_v60, %v110_v59  ;;  %v36_v63 = vld [vmem:[%s3255_s0] sm:$0xff]  ;;  %v37_v0 = vld [vmem:[%s3255_s0 + $0x8] sm:$0xff]  ;;  %v38_v8 = vld [vmem:[%s3255_s0 + $0x10] sm:$0xff] }
  0x10   :  { %2209 = vrot.lane.b32.xlu0 %v2208_v24, %s2299_s29  ;;  %1821 = vmatprep.subr.bf16.mxu0 %v2297_v3  ;;  %v39_v9 = vld [vmem:[%s3255_s0 + $0x18] sm:$0xff]  ;;  %v40_v18 = vld [vmem:[%s3255_s0 + $0x20] sm:$0xff]  ;;  %v41_v19 = vld [vmem:[%s3255_s0 + $0x28] sm:$0xff] }
  0x11   :  { %2214 = vrot.lane.b32.xlu1 %v2213_v27, %s2299_s29  ;;  %v42_v26 = vld [vmem:[%s3255_s0 + $0x30] sm:$0xff]  ;;  %v43_v27 = vld [vmem:[%s3255_s0 + $0x38] sm:$0xff]  ;;  %v2277_v30 = vld [vmem:[%s3256_s4] sm:$0xff]  }
  0x12   :  { %1900 = vmatpush3.bf16.msra.mxu1 %v2277_v30  ;;  %v44_v36 = vld [vmem:[%s3255_s0 + $0x40] sm:$0xff]  ;;  %v45_v37 = vld [vmem:[%s3255_s0 + $0x48] sm:$0xff]  ;;  %v47_v47 = vld [vmem:[%s3255_s0 + $0x58] sm:$0xff] }
  0x13   :  { %1822 = vmatpush3.bf16.msra.mxu0 %v2276_v42  ;;  %1901 = vmatprep.subr.bf16.mxu1 %v2297_v3  ;;  %v2280_v42 = vld [vmem:[%s3256_s4 + $0x18] sm:$0xff]   ;;  %v2281_v48 = vld [vmem:[%s3256_s4 + $0x20] sm:$0xff]  }
  0x14   :  { %2219 = vrot.lane.b32.xlu0 %v2218_v31, %s2299_s29  ;;  %1991 = vmatprep.subr.bf16.mxu0 %v2297_v3  ;;  %v48_v56 = vld [vmem:[%s3255_s0 + $0x60] sm:$0xff] }
  0x15   :  { %2224 = vrot.lane.b32.xlu1 %v2223_v32, %s2299_s29  ;;  %v2278_v32 = vld [vmem:[%s3256_s4 + $0x8] sm:$0xff]  }
  0x16   :  { %1902 = vmatpush3.bf16.msra.mxu1 %v2278_v32 }
  0x17   :  { %1903 = vmatprep.subr.bf16.mxu1 %v2297_v3 }
  0x18   :  { %2229 = vrot.lane.b32.xlu0 %v2228_v38, %s2299_s29  ;;  %v2279_v38 = vld [vmem:[%s3256_s4 + $0x10] sm:$0xff]  }
  0x19   :  { %2234 = vrot.lane.b32.xlu1 %v2233_v39, %s2299_s29 }
  0x1a   :  { %1904 = vmatpush3.bf16.msra.mxu1 %v2279_v38  ;;  %v2283_v38 = vld [vmem:[%s3256_s4 + $0x30] sm:$0xff]  }
  0x1b   :  { %1905 = vmatprep.subr.bf16.mxu1 %v2297_v3 }
  0x1c   :  { %2239 = vrot.lane.b32.xlu0 %v2238_v45, %s2299_s29 }
  0x1d   :  { %2244 = vrot.lane.b32.xlu1 %v2243_v46, %s2299_s29  ;;  %v46_v46 = vld [vmem:[%s3255_s0 + $0x50] sm:$0xff] }
  0x1e   :  { %1906 = vmatpush3.bf16.msra.mxu1 %v2280_v42  ;;  %v60_v42 = vld [vmem:[%s3255_s0 + $0xc0] sm:$0xff] }
  0x1f   :  { %1907 = vmatprep.subr.bf16.mxu1 %v2297_v3 }
  0x20   :  { %2249 = vrot.lane.b32.xlu0 %v2248_v51, %s2299_s29 }
  0x21   :  { %2254 = vrot.lane.b32.xlu1 %v2253_v52, %s2299_s29  ;;  %v2282_v52 = vld [vmem:[%s3256_s4 + $0x28] sm:$0xff]  }
  0x22   :  { %1908 = vmatpush3.bf16.msra.mxu1 %v2281_v48 }
  0x23   :  { %1909 = vmatprep.subr.bf16.mxu1 %v2297_v3 }
  0x24   :  { %2259 = vrot.lane.b32.xlu0 %v2258_v57, %s2299_s29  ;;  %v49_v57 = vld [vmem:[%s3255_s0 + $0x68] sm:$0xff] }
  0x25   :  { %2264 = vrot.lane.b32.xlu1 %v2263_v58, %s2299_s29 }
  0x26   :  { %1910 = vmatpush3.bf16.msra.mxu1 %v2282_v52  ;;  %v63_v52 = vld [vmem:[%s3255_s0 + $0xd8] sm:$0xff] }
  0x27   :  { %1911 = vmatprep.subr.bf16.mxu1 %v2297_v3 }
  0x28   :  { %2269 = vrot.lane.b32.xlu0 %v2268_v61, %s2299_s29 }
  0x2a   :  { %1912 = vmatpush3.bf16.msra.mxu1 %v2283_v38 }
  0x2b   :  { %1913 = vmatprep.subr.bf16.mxu1 %v2297_v3 }
  0x76   :  { %v2180_v62 = vpop.permute.xlu0 %2179 }
  0x77   :  { %v2182_v1 = vunpack.i.h.bf16 %v2180_v62  ;;  %v2181_v2 = vunpack.i.l.bf16 %v2180_v62  ;;  %v2190_v14 = vpop.permute.xlu1 %2189 }
  0x78   :  { %v2192_v16 = vunpack.i.h.bf16 %v2190_v14  ;;  %v2191_v17 = vunpack.i.l.bf16 %v2190_v14 }
  0x79   :  { %v265_v4 = vsel %vm264_vm1, %v36_v63, %v2181_v2  ;;  %v266_v5 = vsel %vm264_vm1, %v37_v0, %v2182_v1  ;;  %v50_v0 = vld [vmem:[%s3255_s0 + $0x70] sm:$0xff]  ;;  %v51_v1 = vld [vmem:[%s3255_s0 + $0x78] sm:$0xff] }
  0x7a   :  { %v303_v6 = vpack.c.bf16 %v266_v5, %v265_v4  ;;  %v2185_v7 = vpop.permute.xlu0 %2184  ;;  %v269_v20 = vsel %vm264_vm1, %v40_v18, %v2191_v17  ;;  %v270_v21 = vsel %vm264_vm1, %v41_v19, %v2192_v16  ;;  %v54_v17 = vld [vmem:[%s3255_s0 + $0x90] sm:$0xff]  ;;  %v55_v18 = vld [vmem:[%s3255_s0 + $0x98] sm:$0xff] }
  0x7b   :  { %v2187_v10 = vunpack.i.h.bf16 %v2185_v7  ;;  %v2186_v11 = vunpack.i.l.bf16 %v2185_v7  ;;  %v2195_v22 = vpop.permute.xlu1 %2194  ;;  %v305_v23 = vpack.c.bf16 %v270_v21, %v269_v20 }
  0x7c   :  { %1824 = vmatmul.mubr.msk.bf16.vlgmr.msra.gmra.mrb[0].mxu0 %vm361_vm2, %v303_v6  ;;  %v2197_v24 = vunpack.i.h.bf16 %v2195_v22  ;;  %v2196_v25 = vunpack.i.l.bf16 %v2195_v22 }
  0x7d   :  { %v267_v12 = vsel %vm264_vm1, %v38_v8, %v2186_v11  ;;  %v268_v13 = vsel %vm264_vm1, %v39_v9, %v2187_v10  ;;  %1827 = vmatprep.mubr.msk.bf16.mxu0 %vm2298_vm0, %v2297_v3  ;;  %v52_v9 = vld [vmem:[%s3255_s0 + $0x80] sm:$0xff]  ;;  %v53_v10 = vld [vmem:[%s3255_s0 + $0x88] sm:$0xff] }
  0x7e   :  { %v304_v15 = vpack.c.bf16 %v268_v13, %v267_v12  ;;  %v271_v28 = vsel %vm264_vm1, %v42_v26, %v2196_v25  ;;  %v272_v29 = vsel %vm264_vm1, %v43_v27, %v2197_v24  ;;  %v2200_v31 = vpop.permute.xlu0 %2199  ;;  %v56_v25 = vld [vmem:[%s3255_s0 + $0xa0] sm:$0xff]  ;;  %v57_v26 = vld [vmem:[%s3255_s0 + $0xa8] sm:$0xff] }
  0x7f   :  { %v306_v33 = vpack.c.bf16 %v272_v29, %v271_v28  ;;  %v2202_v34 = vunpack.i.h.bf16 %v2200_v31  ;;  %v2201_v35 = vunpack.i.l.bf16 %v2200_v31  ;;  %v2205_v41 = vpop.permute.xlu1 %2204 }
  0x80   :  { %v2207_v44 = vunpack.i.h.bf16 %v2205_v41  ;;  %v2206_v45 = vunpack.i.l.bf16 %v2205_v41 }
  0x81   :  { %v273_v39 = vsel %vm264_vm1, %v44_v36, %v2201_v35  ;;  %v274_v40 = vsel %vm264_vm1, %v45_v37, %v2202_v34  ;;  %v59_v34 = vld [vmem:[%s3255_s0 + $0xb8] sm:$0xff] }
  0x82   :  { %v307_v43 = vpack.c.bf16 %v274_v40, %v273_v39  ;;  %v275_v49 = vsel %vm264_vm1, %v46_v46, %v2206_v45  ;;  %v276_v50 = vsel %vm264_vm1, %v47_v47, %v2207_v44  ;;  %v2210_v51 = vpop.permute.xlu0 %2209  ;;  %v2284_v44 = vld [vmem:[%s3256_s4 + $0x38] sm:$0xff]  }
  0x83   :  { %v308_v53 = vpack.c.bf16 %v276_v50, %v275_v49  ;;  %v2212_v54 = vunpack.i.h.bf16 %v2210_v51  ;;  %v2211_v55 = vunpack.i.l.bf16 %v2210_v51  ;;  %v2215_v60 = vpop.permute.xlu1 %2214  ;;  %1914 = vmatpush3.bf16.msra.mxu1 %v2284_v44  ;;  %v62_v51 = vld [vmem:[%s3255_s0 + $0xd0] sm:$0xff] }
  0x84   :  { %1828 = vmatmul.mubr.msk.bf16.gmra.mrb[4].mxu0 %vm361_vm2, %v304_v15  ;;  %v2217_v62 = vunpack.i.h.bf16 %v2215_v60  ;;  %v2216_v63 = vunpack.i.l.bf16 %v2215_v60  ;;  %2167 = vmatprep.subr.bf16.mxu1 %v2297_v3  ;;  %v65_v60 = vld [vmem:[%s3255_s0 + $0xe8] sm:$0xff] }
  0x85   :  { %1831 = vmatprep.mubr.msk.bf16.mxu0 %vm2298_vm0, %v2297_v3  ;;  %v277_v58 = vsel %vm264_vm1, %v48_v56, %v2211_v55  ;;  %v278_v59 = vsel %vm264_vm1, %v49_v57, %v2212_v54 }
  0x86   :  { %v309_v61 = vpack.c.bf16 %v278_v59, %v277_v58  ;;  %v279_v2 = vsel %vm264_vm1, %v50_v0, %v2216_v63  ;;  %v280_v4 = vsel %vm264_vm1, %v51_v1, %v2217_v62  ;;  %v2220_v5 = vpop.permute.xlu0 %2219  ;;  %v64_v59 = vld [vmem:[%s3255_s0 + $0xe0] sm:$0xff] }
  0x87   :  { %v310_v6 = vpack.c.bf16 %v280_v4, %v279_v2  ;;  %v2222_v7 = vunpack.i.h.bf16 %v2220_v5  ;;  %v2221_v8 = vunpack.i.l.bf16 %v2220_v5  ;;  %v2225_v13 = vpop.permute.xlu1 %2224  ;;  %v66_v4 = vld [vmem:[%s3255_s0 + $0xf0] sm:$0xff]  ;;  %v67_v5 = vld [vmem:[%s3255_s0 + $0xf8] sm:$0xff] }
  0x88   :  { %v2227_v15 = vunpack.i.h.bf16 %v2225_v13  ;;  %v2226_v16 = vunpack.i.l.bf16 %v2225_v13  ;;  %v69_v13 = vld [vmem:[%s3255_s0 + $0x108] sm:$0xff] }
  0x89   :  { %v281_v11 = vsel %vm264_vm1, %v52_v9, %v2221_v8  ;;  %v282_v12 = vsel %vm264_vm1, %v53_v10, %v2222_v7 }
  0x8a   :  { %v311_v14 = vpack.c.bf16 %v282_v12, %v281_v11  ;;  %v283_v19 = vsel %vm264_vm1, %v54_v17, %v2226_v16  ;;  %v284_v20 = vsel %vm264_vm1, %v55_v18, %v2227_v15  ;;  %v2230_v21 = vpop.permute.xlu0 %2229  ;;  %v68_v12 = vld [vmem:[%s3255_s0 + $0x100] sm:$0xff] }
  0x8b   :  { %v312_v22 = vpack.c.bf16 %v284_v20, %v283_v19  ;;  %v2231_v24 = vunpack.i.l.bf16 %v2230_v21  ;;  %v2235_v29 = vpop.permute.xlu1 %2234  ;;  %v70_v20 = vld [vmem:[%s3255_s0 + $0x110] sm:$0xff] }
  0x8c   :  { %1832 = vmatmul.mubr.msk.bf16.gmra.mrb[8].mxu0 %vm361_vm2, %v305_v23  ;;  %v2232_v23 = vunpack.i.h.bf16 %v2230_v21  ;;  %v2237_v31 = vunpack.i.h.bf16 %v2235_v29  ;;  %v2236_v32 = vunpack.i.l.bf16 %v2235_v29  ;;  %v71_v21 = vld [vmem:[%s3255_s0 + $0x118] sm:$0xff]  ;;  %v73_v29 = vld [vmem:[%s3255_s0 + $0x128] sm:$0xf] }
  0x8d   :  { %1835 = vmatprep.mubr.msk.bf16.mxu0 %vm2298_vm0, %v2297_v3  ;;  %v285_v27 = vsel %vm264_vm1, %v56_v25, %v2231_v24 }
  0x8e   :  { %v286_v28 = vsel %vm264_vm1, %v57_v26, %v2232_v23  ;;  %v288_v36 = vsel %vm264_vm1, %v59_v34, %v2237_v31  ;;  %v2240_v37 = vpop.permute.xlu0 %2239  ;;  %v2286_v34 = vld [vmem:[%s3257_s6 + $0x8] sm:$0xff]  }
  0x8f   :  { %v313_v30 = vpack.c.bf16 %v286_v28, %v285_v27  ;;  %v2242_v40 = vunpack.i.h.bf16 %v2240_v37  ;;  %v2241_v41 = vunpack.i.l.bf16 %v2240_v37  ;;  %v2245_v47 = vpop.permute.xlu1 %2244  ;;  %v72_v28 = vld [vmem:[%s3255_s0 + $0x120] sm:$0xff] }
  0x90   :  { %v2247_v49 = vunpack.i.h.bf16 %v2245_v47  ;;  %v2246_v50 = vunpack.i.l.bf16 %v2245_v47 }
  0x91   :  { %v289_v45 = vsel %vm264_vm1, %v60_v42, %v2241_v41 }
  0x92   :  { %v292_v54 = vsel %vm264_vm1, %v63_v52, %v2247_v49  ;;  %v2250_v55 = vpop.permute.xlu0 %2249 }
  0x93   :  { %v2252_v57 = vunpack.i.h.bf16 %v2250_v55  ;;  %v2251_v58 = vunpack.i.l.bf16 %v2250_v55  ;;  %v2255_v63 = vpop.permute.xlu1 %2254 }
  0x94   :  { %1836 = vmatmul.mubr.msk.bf16.gmra.mrb[12].mxu0 %vm361_vm2, %v306_v33  ;;  %v58_v33 = vld [vmem:[%s3255_s0 + $0xb0] sm:$0xff]  ;;  %v2257_v1 = vunpack.i.h.bf16 %v2255_v63  ;;  %v2256_v2 = vunpack.i.l.bf16 %v2255_v63 }
  0x95   :  { %1839 = vmatprep.mubr.msk.bf16.mxu0 %vm2298_vm0, %v2297_v3  ;;  %v287_v35 = vsel %vm264_vm1, %v58_v33, %v2236_v32  ;;  %v294_v62 = vsel %vm264_vm1, %v65_v60, %v2252_v57  ;;  %v2285_v33 = vld [vmem:[%s3257_s6] sm:$0xff]  }
  0x96   :  { %v314_v39 = vpack.c.bf16 %v288_v36, %v287_v35  ;;  %v296_v7 = vsel %vm264_vm1, %v67_v5, %v2257_v1  ;;  %v2260_v8 = vpop.permute.xlu0 %2259  ;;  %1992 = vmatpush3.bf16.msra.mxu0 %v2285_v33  ;;  %v2287_v35 = vld [vmem:[%s3257_s6 + $0x10] sm:$0xff]   ;;  %v2766_v36 = vld [vmem:[%s3258_s3] ss:$0 sm:$0xff] }
  0x97   :  { %v2262_v10 = vunpack.i.h.bf16 %v2260_v8  ;;  %v2261_v11 = vunpack.i.l.bf16 %v2260_v8  ;;  %v2265_v16 = vpop.permute.xlu1 %2264  ;;  %1993 = vmatprep.subr.bf16.mxu0 %v2297_v3  ;;  %v2289_v5 = vld [vmem:[%s3257_s6 + $0x20] sm:$0xff]  }
  0x98   :  { %v2267_v18 = vunpack.i.h.bf16 %v2265_v16  ;;  %v2266_v19 = vunpack.i.l.bf16 %v2265_v16 }
  0x99   :  { %v298_v15 = vsel %vm264_vm1, %v69_v13, %v2262_v10  ;;  %v2291_v13 = vld [vmem:[%s3257_s6 + $0x30] sm:$0xff]  }
  0x9a   :  { %v300_v23 = vsel %vm264_vm1, %v71_v21, %v2267_v18  ;;  %v2270_v24 = vpop.permute.xlu0 %2269  ;;  %1994 = vmatpush3.bf16.msra.mxu0 %v2286_v34 }
  0x9b   :  { %v2272_v26 = vunpack.i.h.bf16 %v2270_v24  ;;  %v2271_v27 = vunpack.i.l.bf16 %v2270_v24  ;;  %1995 = vmatprep.subr.bf16.mxu0 %v2297_v3 }
  0x9c   :  { %1840 = vmatmul.mubr.msk.bf16.gmra.mrb[16].mxu0 %vm361_vm2, %v307_v43  ;;  %v61_v43 = vld [vmem:[%s3255_s0 + $0xc8] sm:$0xff] }
  0x9d   :  { %1843 = vmatprep.mubr.msk.bf16.mxu0 %vm2298_vm0, %v2297_v3  ;;  %v290_v46 = vsel %vm264_vm1, %v61_v43, %v2242_v40  ;;  %v302_v31 = vsel %vm264_vm1, %v73_v29, %v2272_v26 }
  0x9e   :  { %v315_v48 = vpack.c.bf16 %v290_v46, %v289_v45  ;;  %1996 = vmatpush3.bf16.msra.mxu0 %v2287_v35  ;;  %v2288_v46 = vld [vmem:[%s3257_s6 + $0x18] sm:$0xff]  }
  0x9f   :  { %1997 = vmatprep.subr.bf16.mxu0 %v2297_v3 }
  0xa2   :  { %1998 = vmatpush3.bf16.msra.mxu0 %v2288_v46 }
  0xa3   :  { %1999 = vmatprep.subr.bf16.mxu0 %v2297_v3 }
  0xa4   :  { %1844 = vmatmul.mubr.msk.bf16.gmra.mrb[20].mxu0 %vm361_vm2, %v308_v53  ;;  %v291_v53 = vsel %vm264_vm1, %v62_v51, %v2246_v50 }
  0xa5   :  { %1847 = vmatprep.mubr.msk.bf16.mxu0 %vm2298_vm0, %v2297_v3  ;;  %v316_v56 = vpack.c.bf16 %v292_v54, %v291_v53 }
  0xa6   :  { %2000 = vmatpush3.bf16.msra.mxu0 %v2289_v5 }
  0xa7   :  { %2001 = vmatprep.subr.bf16.mxu0 %v2297_v3 }
  0xac   :  { %1848 = vmatmul.mubr.msk.bf16.gmra.mrb[24].mxu0 %vm361_vm2, %v309_v61  ;;  %v293_v61 = vsel %vm264_vm1, %v64_v59, %v2251_v58 }
  0xad   :  { %1851 = vmatprep.mubr.msk.bf16.mxu0 %vm2298_vm0, %v2297_v3  ;;  %v317_v0 = vpack.c.bf16 %v294_v62, %v293_v61 }
  0xb4   :  { %1852 = vmatmul.mubr.msk.bf16.gmra.mrb[28].mxu0 %vm361_vm2, %v310_v6  ;;  %v295_v6 = vsel %vm264_vm1, %v66_v4, %v2256_v2 }
  0xb5   :  { %1855 = vmatprep.mubr.msk.bf16.mxu0 %vm2298_vm0, %v2297_v3  ;;  %v318_v9 = vpack.c.bf16 %v296_v7, %v295_v6 }
  0xbc   :  { %1856 = vmatmul.mubr.msk.bf16.gmra.mrb[32].mxu0 %vm361_vm2, %v311_v14  ;;  %v297_v14 = vsel %vm264_vm1, %v68_v12, %v2261_v11 }
  0xbd   :  { %1859 = vmatprep.mubr.msk.bf16.mxu0 %vm2298_vm0, %v2297_v3  ;;  %v319_v17 = vpack.c.bf16 %v298_v15, %v297_v14 }
  0xc4   :  { %1860 = vmatmul.mubr.msk.bf16.gmra.mrb[36].mxu0 %vm361_vm2, %v312_v22  ;;  %v299_v22 = vsel %vm264_vm1, %v70_v20, %v2266_v19  ;;  %v2292_v20 = vld [vmem:[%s3257_s6 + $0x38] sm:$0xff]  }
  0xc5   :  { %1863 = vmatprep.mubr.msk.bf16.mxu0 %vm2298_vm0, %v2297_v3  ;;  %v320_v25 = vpack.c.bf16 %v300_v23, %v299_v22 }
  0xcc   :  { %1864 = vmatmul.mubr.msk.bf16.gmra.mrb[40].mxu0 %vm361_vm2, %v313_v30  ;;  %v301_v30 = vsel %vm264_vm1, %v72_v28, %v2271_v27 }
  0xcd   :  { %1867 = vmatprep.mubr.msk.bf16.mxu0 %vm2298_vm0, %v2297_v3  ;;  %v321_v32 = vpack.c.bf16 %v302_v31, %v301_v30 }
  0xd4   :  { %1868 = vmatmul.mubr.msk.bf16.gmra.mrb[44].mxu0 %vm361_vm2, %v314_v39 }
  0xd5   :  { %1871 = vmatprep.mubr.msk.bf16.mxu0 %vm2298_vm0, %v2297_v3 }
  0xdc   :  { %1872 = vmatmul.mubr.msk.bf16.gmra.mrb[48].mxu0 %vm361_vm2, %v315_v48 }
  0xdd   :  { %1875 = vmatprep.mubr.msk.bf16.mxu0 %vm2298_vm0, %v2297_v3 }
  0xe4   :  { %1876 = vmatmul.mubr.msk.bf16.gmra.mrb[52].mxu0 %vm361_vm2, %v316_v56 }
  0xe5   :  { %1879 = vmatprep.mubr.msk.bf16.mxu0 %vm2298_vm0, %v2297_v3 }
  0xec   :  { %1880 = vmatmul.mubr.msk.bf16.gmra.mrb[56].mxu0 %vm361_vm2, %v317_v0 }
  0xed   :  { %1883 = vmatprep.mubr.msk.bf16.mxu0 %vm2298_vm0, %v2297_v3 }
  0xf4   :  { %1884 = vmatmul.mubr.msk.bf16.gmra.mrb[60].mxu0 %vm361_vm2, %v318_v9  ;;  %v2290_v9 = vld [vmem:[%s3257_s6 + $0x28] sm:$0xff]  }
  0xf5   :  { %1887 = vmatprep.mubr.msk.bf16.mxu0 %vm2298_vm0, %v2297_v3  ;;  %2002 = vmatpush3.bf16.msra.mxu0 %v2290_v9 }
  0xf6   :  { %2003 = vmatprep.subr.bf16.mxu0 %v2297_v3 }
  0xf9   :  { %2004 = vmatpush3.bf16.msra.mxu0 %v2291_v13 }
  0xfa   :  { %2005 = vmatprep.subr.bf16.mxu0 %v2297_v3 }
  0xfc   :  { %1888 = vmatmul.mubr.msk.bf16.gmra.mrb[64].mxu0 %vm361_vm2, %v319_v17 }
  0xfd   :  { %1891 = vmatprep.mubr.msk.bf16.mxu0 %vm2298_vm0, %v2297_v3  ;;  %2006 = vmatpush3.bf16.msra.mxu0 %v2292_v20 }
  0xfe   :  { %2083 = vmatprep.subr.bf16.mxu0 %v2297_v3 }
 0x104   :  { %1892 = vmatmul.mubr.msk.bf16.gmra.mrb[68].mxu0 %vm361_vm2, %v320_v25 }
 0x105   :  { %1895 = vmatprep.mubr.msk.bf16.mxu0 %vm2298_vm0, %v2297_v3 }
 0x10c   :  { %1896 = vmatmul.mubr.msk.bf16.gmra.mrb[72].mxu0 %vm361_vm2, %v321_v32 }
 0x10d   :  { %2007 = vmatprep.mubr.msk.bf16.mxu0 %vm2298_vm0, %v2297_v3 }
 0x14f   :  { %v453_v37 = vpop.f32.mrb[0].mxu0 }
 0x150   :  { %v454_v38 = vadd.f32 %v2766_v36, %v453_v37  ;;  %v1825_v39 = vpop.f32.mrb[1].mxu0 }
 0x151   :  { %v456_v40 = vpop.f32.mrb[2].mxu0 }
 0x152   :  { %v457_v41 = vadd.f32 %v2766_v36, %v456_v40  ;;  %v1826_v42 = vpop.f32.mrb[3].mxu0  ;;  %v604_v43 = vmax.f32 %v454_v38, 0.0 }
 0x154   :  { %v605_v44 = vmax.f32 %v457_v41, 0.0 }
 0x156   :  { %v642_v45 = vpack.c.bf16 %v605_v44, %v604_v43 }
 0x157   :  { %v461_v47 = vpop.f32.mrb[4].mxu0 }
 0x158   :  { %v462_v48 = vadd.f32 %v2766_v36, %v461_v47  ;;  %v1829_v49 = vpop.f32.mrb[5].mxu0  ;;  %1916 = vmatmul.mubr.bf16.vlgmr.msra.gmra.mrb[0].mxu1 %v642_v45 }
 0x159   :  { %v464_v50 = vpop.f32.mrb[6].mxu0  ;;  %1919 = vmatprep.mubr.msk.bf16.mxu1 %vm2298_vm0, %v2297_v3 }
 0x15a   :  { %v465_v51 = vadd.f32 %v2766_v36, %v464_v50  ;;  %v1830_v52 = vpop.f32.mrb[7].mxu0  ;;  %v606_v53 = vmax.f32 %v462_v48, 0.0 }
 0x15c   :  { %v607_v54 = vmax.f32 %v465_v51, 0.0 }
 0x15e   :  { %v643_v55 = vpack.c.bf16 %v607_v54, %v606_v53 }
 0x15f   :  { %v469_v56 = vpop.f32.mrb[8].mxu0 }
 0x160   :  { %v470_v57 = vadd.f32 %v2766_v36, %v469_v56  ;;  %v1833_v58 = vpop.f32.mrb[9].mxu0  ;;  %1920 = vmatmul.mubr.bf16.gmra.mrb[4].mxu1 %v643_v55 }
 0x161   :  { %v472_v59 = vpop.f32.mrb[10].mxu0  ;;  %1923 = vmatprep.mubr.msk.bf16.mxu1 %vm2298_vm0, %v2297_v3 }
 0x162   :  { %v473_v60 = vadd.f32 %v2766_v36, %v472_v59  ;;  %v1834_v61 = vpop.f32.mrb[11].mxu0  ;;  %v608_v62 = vmax.f32 %v470_v57, 0.0 }
 0x164   :  { %v609_v63 = vmax.f32 %v473_v60, 0.0 }
 0x166   :  { %v644_v0 = vpack.c.bf16 %v609_v63, %v608_v62 }
 0x167   :  { %v477_v1 = vpop.f32.mrb[12].mxu0 }
 0x168   :  { %v478_v2 = vadd.f32 %v2766_v36, %v477_v1  ;;  %v1837_v4 = vpop.f32.mrb[13].mxu0  ;;  %1924 = vmatmul.mubr.bf16.gmra.mrb[8].mxu1 %v644_v0 }
 0x169   :  { %v480_v6 = vpop.f32.mrb[14].mxu0  ;;  %1927 = vmatprep.mubr.msk.bf16.mxu1 %vm2298_vm0, %v2297_v3 }
 0x16a   :  { %v481_v7 = vadd.f32 %v2766_v36, %v480_v6  ;;  %v1838_v8 = vpop.f32.mrb[15].mxu0  ;;  %v610_v10 = vmax.f32 %v478_v2, 0.0 }
 0x16c   :  { %v611_v11 = vmax.f32 %v481_v7, 0.0 }
 0x16e   :  { %v645_v12 = vpack.c.bf16 %v611_v11, %v610_v10 }
 0x16f   :  { %v485_v14 = vpop.f32.mrb[16].mxu0 }
 0x170   :  { %v486_v15 = vadd.f32 %v2766_v36, %v485_v14  ;;  %v1841_v16 = vpop.f32.mrb[17].mxu0  ;;  %1928 = vmatmul.mubr.bf16.gmra.mrb[12].mxu1 %v645_v12 }
 0x171   :  { %v488_v17 = vpop.f32.mrb[18].mxu0  ;;  %1931 = vmatprep.mubr.msk.bf16.mxu1 %vm2298_vm0, %v2297_v3 }
 0x172   :  { %v489_v18 = vadd.f32 %v2766_v36, %v488_v17  ;;  %v1842_v19 = vpop.f32.mrb[19].mxu0  ;;  %v612_v21 = vmax.f32 %v486_v15, 0.0 }
 0x174   :  { %v613_v22 = vmax.f32 %v489_v18, 0.0 }
 0x176   :  { %v646_v23 = vpack.c.bf16 %v613_v22, %v612_v21 }
 0x177   :  { %v493_v24 = vpop.f32.mrb[20].mxu0 }
 0x178   :  { %v494_v25 = vadd.f32 %v2766_v36, %v493_v24  ;;  %v1845_v26 = vpop.f32.mrb[21].mxu0  ;;  %1932 = vmatmul.mubr.bf16.gmra.mrb[16].mxu1 %v646_v23 }
 0x179   :  { %v496_v27 = vpop.f32.mrb[22].mxu0  ;;  %1935 = vmatprep.mubr.msk.bf16.mxu1 %vm2298_vm0, %v2297_v3 }
 0x17a   :  { %v497_v28 = vadd.f32 %v2766_v36, %v496_v27  ;;  %v1846_v29 = vpop.f32.mrb[23].mxu0  ;;  %v614_v30 = vmax.f32 %v494_v25, 0.0 }
 0x17c   :  { %v615_v31 = vmax.f32 %v497_v28, 0.0 }
 0x17e   :  { %v647_v32 = vpack.c.bf16 %v615_v31, %v614_v30 }
 0x17f   :  { %v501_v33 = vpop.f32.mrb[24].mxu0 }
 0x180   :  { %v502_v34 = vadd.f32 %v2766_v36, %v501_v33  ;;  %v1849_v35 = vpop.f32.mrb[25].mxu0  ;;  %1936 = vmatmul.mubr.bf16.gmra.mrb[20].mxu1 %v647_v32 }
 0x181   :  { %v504_v37 = vpop.f32.mrb[26].mxu0  ;;  %1939 = vmatprep.mubr.msk.bf16.mxu1 %vm2298_vm0, %v2297_v3 }
 0x182   :  { %v505_v38 = vadd.f32 %v2766_v36, %v504_v37  ;;  %v1850_v39 = vpop.f32.mrb[27].mxu0  ;;  %v616_v40 = vmax.f32 %v502_v34, 0.0 }
 0x184   :  { %v617_v41 = vmax.f32 %v505_v38, 0.0 }
 0x186   :  { %v648_v42 = vpack.c.bf16 %v617_v41, %v616_v40 }
 0x187   :  { %v509_v43 = vpop.f32.mrb[28].mxu0 }
 0x188   :  { %v510_v44 = vadd.f32 %v2766_v36, %v509_v43  ;;  %v1853_v45 = vpop.f32.mrb[29].mxu0  ;;  %1940 = vmatmul.mubr.bf16.gmra.mrb[24].mxu1 %v648_v42 }
 0x189   :  { %v512_v46 = vpop.f32.mrb[30].mxu0  ;;  %1943 = vmatprep.mubr.msk.bf16.mxu1 %vm2298_vm0, %v2297_v3 }
 0x18a   :  { %v513_v47 = vadd.f32 %v2766_v36, %v512_v46  ;;  %v1854_v48 = vpop.f32.mrb[31].mxu0  ;;  %v618_v49 = vmax.f32 %v510_v44, 0.0 }
 0x18c   :  { %v619_v50 = vmax.f32 %v513_v47, 0.0 }
 0x18e   :  { %v649_v51 = vpack.c.bf16 %v619_v50, %v618_v49 }
 0x18f   :  { %v517_v52 = vpop.f32.mrb[32].mxu0 }
 0x190   :  { %v518_v53 = vadd.f32 %v2766_v36, %v517_v52  ;;  %v1857_v54 = vpop.f32.mrb[33].mxu0  ;;  %1944 = vmatmul.mubr.bf16.gmra.mrb[28].mxu1 %v649_v51 }
 0x191   :  { %v520_v55 = vpop.f32.mrb[34].mxu0  ;;  %1947 = vmatprep.mubr.msk.bf16.mxu1 %vm2298_vm0, %v2297_v3 }
 0x192   :  { %v521_v56 = vadd.f32 %v2766_v36, %v520_v55  ;;  %v1858_v57 = vpop.f32.mrb[35].mxu0  ;;  %v620_v58 = vmax.f32 %v518_v53, 0.0 }
 0x194   :  { %v621_v59 = vmax.f32 %v521_v56, 0.0 }
 0x196   :  { %v650_v60 = vpack.c.bf16 %v621_v59, %v620_v58 }
 0x197   :  { %v525_v61 = vpop.f32.mrb[36].mxu0 }
 0x198   :  { %v526_v62 = vadd.f32 %v2766_v36, %v525_v61  ;;  %v1861_v63 = vpop.f32.mrb[37].mxu0  ;;  %1948 = vmatmul.mubr.bf16.gmra.mrb[32].mxu1 %v650_v60 }
 0x199   :  { %v528_v0 = vpop.f32.mrb[38].mxu0  ;;  %1951 = vmatprep.mubr.msk.bf16.mxu1 %vm2298_vm0, %v2297_v3 }
 0x19a   :  { %v529_v1 = vadd.f32 %v2766_v36, %v528_v0  ;;  %v1862_v2 = vpop.f32.mrb[39].mxu0  ;;  %v622_v4 = vmax.f32 %v526_v62, 0.0 }
 0x19c   :  { %v623_v5 = vmax.f32 %v529_v1, 0.0 }
 0x19e   :  { %v651_v6 = vpack.c.bf16 %v623_v5, %v622_v4 }
 0x19f   :  { %v533_v7 = vpop.f32.mrb[40].mxu0 }
 0x1a0   :  { %v534_v8 = vadd.f32 %v2766_v36, %v533_v7  ;;  %v1865_v9 = vpop.f32.mrb[41].mxu0  ;;  %1952 = vmatmul.mubr.bf16.gmra.mrb[36].mxu1 %v651_v6 }
 0x1a1   :  { %v536_v10 = vpop.f32.mrb[42].mxu0  ;;  %1955 = vmatprep.mubr.msk.bf16.mxu1 %vm2298_vm0, %v2297_v3 }
 0x1a2   :  { %v537_v11 = vadd.f32 %v2766_v36, %v536_v10  ;;  %v1866_v12 = vpop.f32.mrb[43].mxu0  ;;  %v624_v13 = vmax.f32 %v534_v8, 0.0 }
 0x1a4   :  { %v625_v14 = vmax.f32 %v537_v11, 0.0 }
 0x1a6   :  { %v652_v15 = vpack.c.bf16 %v625_v14, %v624_v13 }
 0x1a7   :  { %v541_v16 = vpop.f32.mrb[44].mxu0 }
 0x1a8   :  { %v542_v17 = vadd.f32 %v2766_v36, %v541_v16  ;;  %v1869_v18 = vpop.f32.mrb[45].mxu0  ;;  %1956 = vmatmul.mubr.bf16.gmra.mrb[40].mxu1 %v652_v15 }
 0x1a9   :  { %v544_v19 = vpop.f32.mrb[46].mxu0  ;;  %1959 = vmatprep.mubr.msk.bf16.mxu1 %vm2298_vm0, %v2297_v3 }
 0x1aa   :  { %v545_v20 = vadd.f32 %v2766_v36, %v544_v19  ;;  %v1870_v21 = vpop.f32.mrb[47].mxu0  ;;  %v626_v22 = vmax.f32 %v542_v17, 0.0 }
 0x1ac   :  { %v627_v23 = vmax.f32 %v545_v20, 0.0 }
 0x1ae   :  { %v653_v24 = vpack.c.bf16 %v627_v23, %v626_v22 }
 0x1af   :  { %v549_v25 = vpop.f32.mrb[48].mxu0 }
 0x1b0   :  { %v550_v26 = vadd.f32 %v2766_v36, %v549_v25  ;;  %v1873_v27 = vpop.f32.mrb[49].mxu0  ;;  %1960 = vmatmul.mubr.bf16.gmra.mrb[44].mxu1 %v653_v24 }
 0x1b1   :  { %v552_v28 = vpop.f32.mrb[50].mxu0  ;;  %1963 = vmatprep.mubr.msk.bf16.mxu1 %vm2298_vm0, %v2297_v3  ;;  %v2871_v27 = vld [vmem:[%s3260_s5] ss:$0 sm:$0xff] }
 0x1b2   :  { %v553_v29 = vadd.f32 %v2766_v36, %v552_v28  ;;  %v1874_v30 = vpop.f32.mrb[51].mxu0  ;;  %v628_v31 = vmax.f32 %v550_v26, 0.0  ;;  %v2293_v26 = vld [vmem:[%s3259_s8] sm:$0xff]  }
 0x1b3   :  { %2171 = vmatpush3.bf16.msra.mxu1 %v2293_v26 }
 0x1b4   :  { %v629_v32 = vmax.f32 %v553_v29, 0.0  ;;  %2168 = vmatprep.subr.bf16.mxu1 %v2297_v3 }
 0x1b6   :  { %v654_v33 = vpack.c.bf16 %v629_v32, %v628_v31 }
 0x1b7   :  { %v557_v34 = vpop.f32.mrb[52].mxu0 }
 0x1b8   :  { %v558_v35 = vadd.f32 %v2766_v36, %v557_v34  ;;  %v1877_v37 = vpop.f32.mrb[53].mxu0  ;;  %1964 = vmatmul.mubr.bf16.gmra.mrb[48].mxu1 %v654_v33 }
 0x1b9   :  { %v560_v38 = vpop.f32.mrb[54].mxu0  ;;  %1967 = vmatprep.mubr.msk.bf16.mxu1 %vm2298_vm0, %v2297_v3 }
 0x1ba   :  { %v561_v39 = vadd.f32 %v2766_v36, %v560_v38  ;;  %v1878_v40 = vpop.f32.mrb[55].mxu0  ;;  %v630_v41 = vmax.f32 %v558_v35, 0.0 }
 0x1bc   :  { %v631_v42 = vmax.f32 %v561_v39, 0.0 }
 0x1be   :  { %v655_v43 = vpack.c.bf16 %v631_v42, %v630_v41 }
 0x1bf   :  { %v565_v44 = vpop.f32.mrb[56].mxu0 }
 0x1c0   :  { %v566_v45 = vadd.f32 %v2766_v36, %v565_v44  ;;  %v1881_v46 = vpop.f32.mrb[57].mxu0  ;;  %1968 = vmatmul.mubr.bf16.gmra.mrb[52].mxu1 %v655_v43 }
 0x1c1   :  { %v568_v47 = vpop.f32.mrb[58].mxu0  ;;  %1971 = vmatprep.mubr.msk.bf16.mxu1 %vm2298_vm0, %v2297_v3 }
 0x1c2   :  { %v569_v48 = vadd.f32 %v2766_v36, %v568_v47  ;;  %v1882_v49 = vpop.f32.mrb[59].mxu0  ;;  %v632_v50 = vmax.f32 %v566_v45, 0.0 }
 0x1c4   :  { %v633_v51 = vmax.f32 %v569_v48, 0.0 }
 0x1c6   :  { %v656_v52 = vpack.c.bf16 %v633_v51, %v632_v50 }
 0x1c7   :  { %v573_v53 = vpop.f32.mrb[60].mxu0 }
 0x1c8   :  { %v574_v54 = vadd.f32 %v2766_v36, %v573_v53  ;;  %v1885_v55 = vpop.f32.mrb[61].mxu0  ;;  %1972 = vmatmul.mubr.bf16.gmra.mrb[56].mxu1 %v656_v52 }
 0x1c9   :  { %v576_v56 = vpop.f32.mrb[62].mxu0  ;;  %1975 = vmatprep.mubr.msk.bf16.mxu1 %vm2298_vm0, %v2297_v3 }
 0x1ca   :  { %v577_v57 = vadd.f32 %v2766_v36, %v576_v56  ;;  %v1886_v58 = vpop.f32.mrb[63].mxu0  ;;  %v634_v59 = vmax.f32 %v574_v54, 0.0 }
 0x1cc   :  { %v635_v60 = vmax.f32 %v577_v57, 0.0 }
 0x1ce   :  { %v657_v61 = vpack.c.bf16 %v635_v60, %v634_v59  ;;  %v2295_v59 = vld [vmem:[%s3259_s8 + $0x10] sm:$0xff]  }
 0x1cf   :  { %v581_v62 = vpop.f32.mrb[64].mxu0 }
 0x1d0   :  { %v582_v63 = vadd.f32 %v2766_v36, %v581_v62  ;;  %v1889_v0 = vpop.f32.mrb[65].mxu0  ;;  %1976 = vmatmul.mubr.bf16.gmra.mrb[60].mxu1 %v657_v61 }
 0x1d1   :  { %v584_v1 = vpop.f32.mrb[66].mxu0  ;;  %1979 = vmatprep.mubr.msk.bf16.mxu1 %vm2298_vm0, %v2297_v3 }
 0x1d2   :  { %v585_v2 = vadd.f32 %v2766_v36, %v584_v1  ;;  %v1890_v4 = vpop.f32.mrb[67].mxu0  ;;  %v636_v5 = vmax.f32 %v582_v63, 0.0  ;;  %v2296_v63 = vld [vmem:[%s3259_s8 + $0x18] sm:$0xff]  }
 0x1d4   :  { %v637_v6 = vmax.f32 %v585_v2, 0.0 }
 0x1d6   :  { %v658_v7 = vpack.c.bf16 %v637_v6, %v636_v5 }
 0x1d7   :  { %v589_v8 = vpop.f32.mrb[68].mxu0 }
 0x1d8   :  { %v590_v9 = vadd.f32 %v2766_v36, %v589_v8  ;;  %v1893_v10 = vpop.f32.mrb[69].mxu0  ;;  %1980 = vmatmul.mubr.bf16.gmra.mrb[64].mxu1 %v658_v7 }
 0x1d9   :  { %v592_v11 = vpop.f32.mrb[70].mxu0  ;;  %1983 = vmatprep.mubr.msk.bf16.mxu1 %vm2298_vm0, %v2297_v3 }
 0x1da   :  { %v593_v12 = vadd.f32 %v2766_v36, %v592_v11  ;;  %v1894_v13 = vpop.f32.mrb[71].mxu0  ;;  %v638_v14 = vmax.f32 %v590_v9, 0.0 }
 0x1dc   :  { %v639_v15 = vmax.f32 %v593_v12, 0.0 }
 0x1de   :  { %v659_v16 = vpack.c.bf16 %v639_v15, %v638_v14 }
 0x1df   :  { %v597_v17 = vpop.f32.mrb[72].mxu0 }
 0x1e0   :  { %v598_v18 = vadd.f32 %v2766_v36, %v597_v17  ;;  %v1897_v19 = vpop.f32.mrb[73].mxu0  ;;  %1984 = vmatmul.mubr.bf16.gmra.mrb[68].mxu1 %v659_v16 }
 0x1e1   :  { %v600_v20 = vpop.f32.mrb[74].mxu0  ;;  %1987 = vmatprep.mubr.msk.bf16.mxu1 %vm2298_vm0, %v2297_v3 }
 0x1e2   :  { %v601_v21 = vadd.f32 %v2766_v36, %v600_v20  ;;  %v1898_v22 = vpop.f32.mrb[75].mxu0  ;;  %v640_v23 = vmax.f32 %v598_v18, 0.0  ;;  %v2294_v36 = vld [vmem:[%s3259_s8 + $0x8] sm:$0xff]  }
 0x1e3   :  { %2172 = vmatpush3.bf16.msra.mxu1 %v2294_v36 }
 0x1e4   :  { %v641_v24 = vmax.f32 %v601_v21, 0.0  ;;  %2169 = vmatprep.subr.bf16.mxu1 %v2297_v3 }
 0x1e6   :  { %v660_v25 = vpack.c.bf16 %v641_v24, %v640_v23 }
 0x1e7   :  { %2173 = vmatpush3.bf16.msra.mxu1 %v2295_v59 }
 0x1e8   :  { %1988 = vmatmul.mubr.bf16.gmra.mrb[72].mxu1 %v660_v25  ;;  %2170 = vmatprep.subr.bf16.mxu1 %v2297_v3 }
 0x1e9   :  { %2095 = vmatprep.mubr.msk.bf16.mxu1 %vm2298_vm0, %v2297_v3 }
 0x1eb   :  { %2174 = vmatpush3.bf16.msra.mxu1 %v2296_v63 }
 0x22b   :  { %v766_v28 = vpop.f32.mrb[0].mxu1 }
 0x22c   :  { %v767_v29 = vadd.f32 %v2871_v27, %v766_v28  ;;  %v1917_v30 = vpop.f32.mrb[1].mxu1 }
 0x22d   :  { %v769_v31 = vpop.f32.mrb[2].mxu1 }
 0x22e   :  { %v770_v32 = vadd.f32 %v2871_v27, %v769_v31  ;;  %v1918_v33 = vpop.f32.mrb[3].mxu1  ;;  %v917_v34 = vmax.f32 %v767_v29, 0.0 }
 0x230   :  { %v918_v35 = vmax.f32 %v770_v32, 0.0 }
 0x232   :  { %v955_v37 = vpack.c.bf16 %v918_v35, %v917_v34 }
 0x233   :  { %v774_v38 = vpop.f32.mrb[4].mxu1 }
 0x234   :  { %v775_v39 = vadd.f32 %v2871_v27, %v774_v38  ;;  %v1921_v40 = vpop.f32.mrb[5].mxu1  ;;  %2008 = vmatmul.mubr.bf16.vlgmr.msra.gmra.mrb[76].mxu0 %v955_v37 }
 0x235   :  { %v777_v41 = vpop.f32.mrb[6].mxu1  ;;  %2011 = vmatprep.mubr.msk.bf16.mxu0 %vm2298_vm0, %v2297_v3  ;;  %2084 = vmatpush3.bf16.msra.mxu0 %v2293_v26 }
 0x236   :  { %v778_v42 = vadd.f32 %v2871_v27, %v777_v41  ;;  %v1922_v43 = vpop.f32.mrb[7].mxu1  ;;  %2085 = vmatprep.subr.bf16.mxu0 %v2297_v3  ;;  %v919_v44 = vmax.f32 %v775_v39, 0.0 }
 0x238   :  { %v920_v45 = vmax.f32 %v778_v42, 0.0 }
 0x239   :  { %2086 = vmatpush3.bf16.msra.mxu0 %v2294_v36 }
 0x23a   :  { %v956_v46 = vpack.c.bf16 %v920_v45, %v919_v44  ;;  %2087 = vmatprep.subr.bf16.mxu0 %v2297_v3 }
 0x23b   :  { %v782_v47 = vpop.f32.mrb[8].mxu1 }
 0x23c   :  { %v783_v48 = vadd.f32 %v2871_v27, %v782_v47  ;;  %v1925_v49 = vpop.f32.mrb[9].mxu1  ;;  %2012 = vmatmul.mubr.bf16.gmra.mrb[80].mxu0 %v956_v46 }
 0x23d   :  { %v785_v50 = vpop.f32.mrb[10].mxu1  ;;  %2015 = vmatprep.mubr.msk.bf16.mxu0 %vm2298_vm0, %v2297_v3  ;;  %2088 = vmatpush3.bf16.msra.mxu0 %v2295_v59 }
 0x23e   :  { %v786_v51 = vadd.f32 %v2871_v27, %v785_v50  ;;  %v1926_v52 = vpop.f32.mrb[11].mxu1  ;;  %v921_v53 = vmax.f32 %v783_v48, 0.0  ;;  %2089 = vmatprep.subr.bf16.mxu0 %v2297_v3 }
 0x240   :  { %v922_v54 = vmax.f32 %v786_v51, 0.0 }
 0x241   :  { %2090 = vmatpush3.bf16.msra.mxu0 %v2296_v63 }
 0x242   :  { %v957_v55 = vpack.c.bf16 %v922_v54, %v921_v53 }
 0x243   :  { %v790_v56 = vpop.f32.mrb[12].mxu1 }
 0x244   :  { %v791_v57 = vadd.f32 %v2871_v27, %v790_v56  ;;  %v1929_v58 = vpop.f32.mrb[13].mxu1  ;;  %2016 = vmatmul.mubr.bf16.gmra.mrb[84].mxu0 %v957_v55 }
 0x245   :  { %v793_v60 = vpop.f32.mrb[14].mxu1  ;;  %2019 = vmatprep.mubr.msk.bf16.mxu0 %vm2298_vm0, %v2297_v3 }
 0x246   :  { %v794_v61 = vadd.f32 %v2871_v27, %v793_v60  ;;  %v1930_v62 = vpop.f32.mrb[15].mxu1  ;;  %v923_v0 = vmax.f32 %v791_v57, 0.0 }
 0x248   :  { %v924_v1 = vmax.f32 %v794_v61, 0.0 }
 0x24a   :  { %v958_v2 = vpack.c.bf16 %v924_v1, %v923_v0 }
 0x24b   :  { %v798_v4 = vpop.f32.mrb[16].mxu1 }
 0x24c   :  { %v799_v5 = vadd.f32 %v2871_v27, %v798_v4  ;;  %v1933_v6 = vpop.f32.mrb[17].mxu1  ;;  %2020 = vmatmul.mubr.bf16.gmra.mrb[88].mxu0 %v958_v2 }
 0x24d   :  { %v801_v7 = vpop.f32.mrb[18].mxu1  ;;  %2023 = vmatprep.mubr.msk.bf16.mxu0 %vm2298_vm0, %v2297_v3 }
 0x24e   :  { %v802_v8 = vadd.f32 %v2871_v27, %v801_v7  ;;  %v1934_v9 = vpop.f32.mrb[19].mxu1  ;;  %v925_v10 = vmax.f32 %v799_v5, 0.0 }
 0x250   :  { %v926_v11 = vmax.f32 %v802_v8, 0.0 }
 0x252   :  { %v959_v12 = vpack.c.bf16 %v926_v11, %v925_v10 }
 0x253   :  { %v806_v13 = vpop.f32.mrb[20].mxu1 }
 0x254   :  { %v807_v14 = vadd.f32 %v2871_v27, %v806_v13  ;;  %v1937_v15 = vpop.f32.mrb[21].mxu1  ;;  %2024 = vmatmul.mubr.bf16.gmra.mrb[92].mxu0 %v959_v12 }
 0x255   :  { %v809_v16 = vpop.f32.mrb[22].mxu1  ;;  %2027 = vmatprep.mubr.msk.bf16.mxu0 %vm2298_vm0, %v2297_v3 }
 0x256   :  { %v810_v17 = vadd.f32 %v2871_v27, %v809_v16  ;;  %v1938_v18 = vpop.f32.mrb[23].mxu1  ;;  %v927_v19 = vmax.f32 %v807_v14, 0.0 }
 0x258   :  { %v928_v20 = vmax.f32 %v810_v17, 0.0 }
 0x25a   :  { %v960_v21 = vpack.c.bf16 %v928_v20, %v927_v19 }
 0x25b   :  { %v814_v22 = vpop.f32.mrb[24].mxu1 }
 0x25c   :  { %v815_v23 = vadd.f32 %v2871_v27, %v814_v22  ;;  %v1941_v24 = vpop.f32.mrb[25].mxu1  ;;  %2028 = vmatmul.mubr.bf16.gmra.mrb[96].mxu0 %v960_v21 }
 0x25d   :  { %v817_v25 = vpop.f32.mrb[26].mxu1  ;;  %2031 = vmatprep.mubr.msk.bf16.mxu0 %vm2298_vm0, %v2297_v3 }
 0x25e   :  { %v818_v26 = vadd.f32 %v2871_v27, %v817_v25  ;;  %v1942_v36 = vpop.f32.mrb[27].mxu1  ;;  %v929_v28 = vmax.f32 %v815_v23, 0.0 }
 0x260   :  { %v930_v29 = vmax.f32 %v818_v26, 0.0 }
 0x262   :  { %v961_v30 = vpack.c.bf16 %v930_v29, %v929_v28 }
 0x263   :  { %v822_v31 = vpop.f32.mrb[28].mxu1 }
 0x264   :  { %v823_v32 = vadd.f32 %v2871_v27, %v822_v31  ;;  %v1945_v33 = vpop.f32.mrb[29].mxu1  ;;  %2032 = vmatmul.mubr.bf16.gmra.mrb[100].mxu0 %v961_v30 }
 0x265   :  { %v825_v34 = vpop.f32.mrb[30].mxu1  ;;  %2035 = vmatprep.mubr.msk.bf16.mxu0 %vm2298_vm0, %v2297_v3 }
 0x266   :  { %v826_v35 = vadd.f32 %v2871_v27, %v825_v34  ;;  %v1946_v37 = vpop.f32.mrb[31].mxu1  ;;  %v931_v38 = vmax.f32 %v823_v32, 0.0 }
 0x268   :  { %v932_v39 = vmax.f32 %v826_v35, 0.0 }
 0x26a   :  { %v962_v40 = vpack.c.bf16 %v932_v39, %v931_v38 }
 0x26b   :  { %v830_v41 = vpop.f32.mrb[32].mxu1 }
 0x26c   :  { %v831_v42 = vadd.f32 %v2871_v27, %v830_v41  ;;  %v1949_v43 = vpop.f32.mrb[33].mxu1  ;;  %2036 = vmatmul.mubr.bf16.gmra.mrb[104].mxu0 %v962_v40 }
 0x26d   :  { %v833_v44 = vpop.f32.mrb[34].mxu1  ;;  %2039 = vmatprep.mubr.msk.bf16.mxu0 %vm2298_vm0, %v2297_v3 }
 0x26e   :  { %v834_v45 = vadd.f32 %v2871_v27, %v833_v44  ;;  %v1950_v46 = vpop.f32.mrb[35].mxu1  ;;  %v933_v47 = vmax.f32 %v831_v42, 0.0 }
 0x270   :  { %v934_v48 = vmax.f32 %v834_v45, 0.0 }
 0x272   :  { %v963_v49 = vpack.c.bf16 %v934_v48, %v933_v47 }
 0x273   :  { %v838_v50 = vpop.f32.mrb[36].mxu1 }
 0x274   :  { %v839_v51 = vadd.f32 %v2871_v27, %v838_v50  ;;  %v1953_v52 = vpop.f32.mrb[37].mxu1  ;;  %2040 = vmatmul.mubr.bf16.gmra.mrb[108].mxu0 %v963_v49 }
 0x275   :  { %v841_v53 = vpop.f32.mrb[38].mxu1  ;;  %2043 = vmatprep.mubr.msk.bf16.mxu0 %vm2298_vm0, %v2297_v3 }
 0x276   :  { %v842_v54 = vadd.f32 %v2871_v27, %v841_v53  ;;  %v1954_v55 = vpop.f32.mrb[39].mxu1  ;;  %v935_v56 = vmax.f32 %v839_v51, 0.0 }
 0x278   :  { %v936_v57 = vmax.f32 %v842_v54, 0.0 }
 0x27a   :  { %v964_v58 = vpack.c.bf16 %v936_v57, %v935_v56 }
 0x27b   :  { %v846_v59 = vpop.f32.mrb[40].mxu1 }
 0x27c   :  { %v847_v60 = vadd.f32 %v2871_v27, %v846_v59  ;;  %v1957_v61 = vpop.f32.mrb[41].mxu1  ;;  %2044 = vmatmul.mubr.bf16.gmra.mrb[112].mxu0 %v964_v58 }
 0x27d   :  { %v849_v62 = vpop.f32.mrb[42].mxu1  ;;  %2047 = vmatprep.mubr.msk.bf16.mxu0 %vm2298_vm0, %v2297_v3 }
 0x27e   :  { %v850_v63 = vadd.f32 %v2871_v27, %v849_v62  ;;  %v1958_v0 = vpop.f32.mrb[43].mxu1  ;;  %v937_v1 = vmax.f32 %v847_v60, 0.0 }
 0x280   :  { %v938_v2 = vmax.f32 %v850_v63, 0.0 }
 0x282   :  { %v965_v4 = vpack.c.bf16 %v938_v2, %v937_v1 }
 0x283   :  { %v854_v5 = vpop.f32.mrb[44].mxu1 }
 0x284   :  { %v855_v6 = vadd.f32 %v2871_v27, %v854_v5  ;;  %v1961_v7 = vpop.f32.mrb[45].mxu1  ;;  %2048 = vmatmul.mubr.bf16.gmra.mrb[116].mxu0 %v965_v4 }
 0x285   :  { %v857_v8 = vpop.f32.mrb[46].mxu1  ;;  %2051 = vmatprep.mubr.msk.bf16.mxu0 %vm2298_vm0, %v2297_v3 }
 0x286   :  { %v858_v9 = vadd.f32 %v2871_v27, %v857_v8  ;;  %v1962_v10 = vpop.f32.mrb[47].mxu1  ;;  %v939_v11 = vmax.f32 %v855_v6, 0.0 }
 0x288   :  { %v940_v12 = vmax.f32 %v858_v9, 0.0 }
 0x28a   :  { %v966_v13 = vpack.c.bf16 %v940_v12, %v939_v11 }
 0x28b   :  { %v862_v14 = vpop.f32.mrb[48].mxu1 }
 0x28c   :  { %v863_v15 = vadd.f32 %v2871_v27, %v862_v14  ;;  %v1965_v16 = vpop.f32.mrb[49].mxu1  ;;  %2052 = vmatmul.mubr.bf16.gmra.mrb[120].mxu0 %v966_v13 }
 0x28d   :  { %v865_v17 = vpop.f32.mrb[50].mxu1  ;;  %2055 = vmatprep.mubr.msk.bf16.mxu0 %vm2298_vm0, %v2297_v3 }
 0x28e   :  { %v866_v18 = vadd.f32 %v2871_v27, %v865_v17  ;;  %v1966_v19 = vpop.f32.mrb[51].mxu1  ;;  %v941_v20 = vmax.f32 %v863_v15, 0.0  ;;  %v2966_v15 = vld [vmem:[%s3261_s7] ss:$0 sm:$0xff] }
 0x290   :  { %v942_v21 = vmax.f32 %v866_v18, 0.0 }
 0x292   :  { %v967_v22 = vpack.c.bf16 %v942_v21, %v941_v20 }
 0x293   :  { %v870_v23 = vpop.f32.mrb[52].mxu1 }
 0x294   :  { %v871_v24 = vadd.f32 %v2871_v27, %v870_v23  ;;  %v1969_v25 = vpop.f32.mrb[53].mxu1  ;;  %2056 = vmatmul.mubr.bf16.gmra.mrb[124].mxu0 %v967_v22 }
 0x295   :  { %v873_v26 = vpop.f32.mrb[54].mxu1  ;;  %2059 = vmatprep.mubr.msk.bf16.mxu0 %vm2298_vm0, %v2297_v3 }
 0x296   :  { %v874_v36 = vadd.f32 %v2871_v27, %v873_v26  ;;  %v1970_v28 = vpop.f32.mrb[55].mxu1  ;;  %v943_v29 = vmax.f32 %v871_v24, 0.0 }
 0x298   :  { %v944_v30 = vmax.f32 %v874_v36, 0.0 }
 0x29a   :  { %v968_v31 = vpack.c.bf16 %v944_v30, %v943_v29 }
 0x29b   :  { %v878_v32 = vpop.f32.mrb[56].mxu1 }
 0x29c   :  { %v879_v33 = vadd.f32 %v2871_v27, %v878_v32  ;;  %v1973_v34 = vpop.f32.mrb[57].mxu1  ;;  %2060 = vmatmul.mubr.bf16.gmra.mrb[128].mxu0 %v968_v31 }
 0x29d   :  { %v881_v35 = vpop.f32.mrb[58].mxu1  ;;  %2063 = vmatprep.mubr.msk.bf16.mxu0 %vm2298_vm0, %v2297_v3 }
 0x29e   :  { %v882_v37 = vadd.f32 %v2871_v27, %v881_v35  ;;  %v1974_v38 = vpop.f32.mrb[59].mxu1  ;;  %v945_v39 = vmax.f32 %v879_v33, 0.0 }
 0x2a0   :  { %v946_v40 = vmax.f32 %v882_v37, 0.0 }
 0x2a2   :  { %v969_v41 = vpack.c.bf16 %v946_v40, %v945_v39 }
 0x2a3   :  { %v886_v42 = vpop.f32.mrb[60].mxu1 }
 0x2a4   :  { %v887_v43 = vadd.f32 %v2871_v27, %v886_v42  ;;  %v1977_v44 = vpop.f32.mrb[61].mxu1  ;;  %2064 = vmatmul.mubr.bf16.gmra.mrb[132].mxu0 %v969_v41 }
 0x2a5   :  { %v889_v45 = vpop.f32.mrb[62].mxu1  ;;  %2067 = vmatprep.mubr.msk.bf16.mxu0 %vm2298_vm0, %v2297_v3 }
 0x2a6   :  { %v890_v46 = vadd.f32 %v2871_v27, %v889_v45  ;;  %v1978_v47 = vpop.f32.mrb[63].mxu1  ;;  %v947_v48 = vmax.f32 %v887_v43, 0.0 }
 0x2a8   :  { %v948_v49 = vmax.f32 %v890_v46, 0.0 }
 0x2aa   :  { %v970_v50 = vpack.c.bf16 %v948_v49, %v947_v48 }
 0x2ab   :  { %v894_v51 = vpop.f32.mrb[64].mxu1 }
 0x2ac   :  { %v895_v52 = vadd.f32 %v2871_v27, %v894_v51  ;;  %v1981_v53 = vpop.f32.mrb[65].mxu1  ;;  %2068 = vmatmul.mubr.bf16.gmra.mrb[136].mxu0 %v970_v50 }
 0x2ad   :  { %v897_v54 = vpop.f32.mrb[66].mxu1  ;;  %2071 = vmatprep.mubr.msk.bf16.mxu0 %vm2298_vm0, %v2297_v3 }
 0x2ae   :  { %v898_v55 = vadd.f32 %v2871_v27, %v897_v54  ;;  %v1982_v56 = vpop.f32.mrb[67].mxu1  ;;  %v949_v57 = vmax.f32 %v895_v52, 0.0 }
 0x2b0   :  { %v950_v58 = vmax.f32 %v898_v55, 0.0 }
 0x2b2   :  { %v971_v59 = vpack.c.bf16 %v950_v58, %v949_v57 }
 0x2b3   :  { %v902_v60 = vpop.f32.mrb[68].mxu1 }
 0x2b4   :  { %v903_v61 = vadd.f32 %v2871_v27, %v902_v60  ;;  %v1985_v62 = vpop.f32.mrb[69].mxu1  ;;  %2072 = vmatmul.mubr.bf16.gmra.mrb[140].mxu0 %v971_v59 }
 0x2b5   :  { %v905_v63 = vpop.f32.mrb[70].mxu1  ;;  %2075 = vmatprep.mubr.msk.bf16.mxu0 %vm2298_vm0, %v2297_v3 }
 0x2b6   :  { %v906_v0 = vadd.f32 %v2871_v27, %v905_v63  ;;  %v1986_v1 = vpop.f32.mrb[71].mxu1  ;;  %v951_v2 = vmax.f32 %v903_v61, 0.0 }
 0x2b8   :  { %v952_v4 = vmax.f32 %v906_v0, 0.0 }
 0x2ba   :  { %v972_v5 = vpack.c.bf16 %v952_v4, %v951_v2 }
 0x2bb   :  { %v910_v6 = vpop.f32.mrb[72].mxu1 }
 0x2bc   :  { %v911_v7 = vadd.f32 %v2871_v27, %v910_v6  ;;  %v1989_v8 = vpop.f32.mrb[73].mxu1  ;;  %2076 = vmatmul.mubr.bf16.gmra.mrb[144].mxu0 %v972_v5 }
 0x2bd   :  { %v913_v9 = vpop.f32.mrb[74].mxu1  ;;  %2079 = vmatprep.mubr.msk.bf16.mxu0 %vm2298_vm0, %v2297_v3 }
 0x2be   :  { %v914_v10 = vadd.f32 %v2871_v27, %v913_v9  ;;  %v1990_v11 = vpop.f32.mrb[75].mxu1  ;;  %v953_v12 = vmax.f32 %v911_v7, 0.0 }
 0x2c0   :  { %v954_v13 = vmax.f32 %v914_v10, 0.0 }
 0x2c2   :  { %v973_v14 = vpack.c.bf16 %v954_v13, %v953_v12 }
 0x2c4   :  { %2080 = vmatmul.mubr.bf16.gmra.mrb[148].mxu0 %v973_v14 }
 0x2c5   :  { %2091 = vmatprep.mubr.msk.bf16.mxu0 %vm2298_vm0, %v2297_v3 }
 0x307   :  { %v1079_v16 = vpop.f32.mrb[76].mxu0 }
 0x308   :  { %v1080_v17 = vadd.f32 %v2966_v15, %v1079_v16  ;;  %v2009_v18 = vpop.f32.mrb[77].mxu0 }
 0x309   :  { %v1082_v19 = vpop.f32.mrb[78].mxu0 }
 0x30a   :  { %v1083_v27 = vadd.f32 %v2966_v15, %v1082_v19  ;;  %v2010_v20 = vpop.f32.mrb[79].mxu0  ;;  %v1230_v21 = vmax.f32 %v1080_v17, 0.0 }
 0x30c   :  { %v1231_v22 = vmax.f32 %v1083_v27, 0.0 }
 0x30e   :  { %v1268_v23 = vpack.c.bf16 %v1231_v22, %v1230_v21 }
 0x30f   :  { %v1087_v24 = vpop.f32.mrb[80].mxu0 }
 0x310   :  { %v1088_v25 = vadd.f32 %v2966_v15, %v1087_v24  ;;  %v2013_v26 = vpop.f32.mrb[81].mxu0  ;;  %2092 = vmatmul.mubr.msk.bf16.vlgmr.msra.gmra.mrb[152].mxu0 %vm361_vm2, %v1268_v23 }
 0x311   :  { %v1090_v36 = vpop.f32.mrb[82].mxu0 }
 0x312   :  { %v1091_v28 = vadd.f32 %v2966_v15, %v1090_v36  ;;  %v2014_v29 = vpop.f32.mrb[83].mxu0  ;;  %v1232_v30 = vmax.f32 %v1088_v25, 0.0 }
 0x314   :  { %v1233_v31 = vmax.f32 %v1091_v28, 0.0 }
 0x316   :  { %v1269_v32 = vpack.c.bf16 %v1233_v31, %v1232_v30 }
 0x317   :  { %v1095_v33 = vpop.f32.mrb[84].mxu0 }
 0x318   :  { %v1096_v34 = vadd.f32 %v2966_v15, %v1095_v33  ;;  %v2017_v35 = vpop.f32.mrb[85].mxu0  ;;  %2096 = vmatmul.mubr.msk.bf16.vlgmr.msra.gmra.mrb[76].mxu1 %vm361_vm2, %v1269_v32 }
 0x319   :  { %v1098_v37 = vpop.f32.mrb[86].mxu0  ;;  %2099 = vmatprep.mubr.msk.bf16.mxu1 %vm2298_vm0, %v2297_v3 }
 0x31a   :  { %v1099_v38 = vadd.f32 %v2966_v15, %v1098_v37  ;;  %v2018_v39 = vpop.f32.mrb[87].mxu0  ;;  %v1234_v40 = vmax.f32 %v1096_v34, 0.0 }
 0x31c   :  { %v1235_v41 = vmax.f32 %v1099_v38, 0.0 }
 0x31e   :  { %v1270_v42 = vpack.c.bf16 %v1235_v41, %v1234_v40 }
 0x31f   :  { %v1103_v43 = vpop.f32.mrb[88].mxu0 }
 0x320   :  { %v1104_v44 = vadd.f32 %v2966_v15, %v1103_v43  ;;  %v2021_v45 = vpop.f32.mrb[89].mxu0  ;;  %2100 = vmatmul.mubr.msk.bf16.gmra.mrb[80].mxu1 %vm361_vm2, %v1270_v42 }
 0x321   :  { %v1106_v46 = vpop.f32.mrb[90].mxu0  ;;  %2103 = vmatprep.mubr.msk.bf16.mxu1 %vm2298_vm0, %v2297_v3 }
 0x322   :  { %v1107_v47 = vadd.f32 %v2966_v15, %v1106_v46  ;;  %v2022_v48 = vpop.f32.mrb[91].mxu0  ;;  %v1236_v49 = vmax.f32 %v1104_v44, 0.0 }
 0x324   :  { %v1237_v50 = vmax.f32 %v1107_v47, 0.0 }
 0x326   :  { %v1271_v51 = vpack.c.bf16 %v1237_v50, %v1236_v49 }
 0x327   :  { %v1111_v52 = vpop.f32.mrb[92].mxu0 }
 0x328   :  { %v1112_v53 = vadd.f32 %v2966_v15, %v1111_v52  ;;  %v2025_v54 = vpop.f32.mrb[93].mxu0  ;;  %2104 = vmatmul.mubr.msk.bf16.gmra.mrb[84].mxu1 %vm361_vm2, %v1271_v51 }
 0x329   :  { %v1114_v55 = vpop.f32.mrb[94].mxu0  ;;  %2107 = vmatprep.mubr.msk.bf16.mxu1 %vm2298_vm0, %v2297_v3 }
 0x32a   :  { %v1115_v56 = vadd.f32 %v2966_v15, %v1114_v55  ;;  %v2026_v57 = vpop.f32.mrb[95].mxu0  ;;  %v1238_v58 = vmax.f32 %v1112_v53, 0.0 }
 0x32c   :  { %v1239_v59 = vmax.f32 %v1115_v56, 0.0 }
 0x32e   :  { %v1272_v60 = vpack.c.bf16 %v1239_v59, %v1238_v58 }
 0x32f   :  { %v1119_v61 = vpop.f32.mrb[96].mxu0 }
 0x330   :  { %v1120_v62 = vadd.f32 %v2966_v15, %v1119_v61  ;;  %v2029_v63 = vpop.f32.mrb[97].mxu0  ;;  %2108 = vmatmul.mubr.msk.bf16.gmra.mrb[88].mxu1 %vm361_vm2, %v1272_v60 }
 0x331   :  { %v1122_v0 = vpop.f32.mrb[98].mxu0  ;;  %2111 = vmatprep.mubr.msk.bf16.mxu1 %vm2298_vm0, %v2297_v3 }
 0x332   :  { %v1123_v1 = vadd.f32 %v2966_v15, %v1122_v0  ;;  %v2030_v2 = vpop.f32.mrb[99].mxu0  ;;  %v1240_v4 = vmax.f32 %v1120_v62, 0.0 }
 0x334   :  { %v1241_v5 = vmax.f32 %v1123_v1, 0.0 }
 0x336   :  { %v1273_v6 = vpack.c.bf16 %v1241_v5, %v1240_v4 }
 0x337   :  { %v1127_v7 = vpop.f32.mrb[100].mxu0 }
 0x338   :  { %v1128_v8 = vadd.f32 %v2966_v15, %v1127_v7  ;;  %v2033_v9 = vpop.f32.mrb[101].mxu0  ;;  %2112 = vmatmul.mubr.msk.bf16.gmra.mrb[92].mxu1 %vm361_vm2, %v1273_v6 }
 0x339   :  { %v1130_v10 = vpop.f32.mrb[102].mxu0  ;;  %2115 = vmatprep.mubr.msk.bf16.mxu1 %vm2298_vm0, %v2297_v3 }
 0x33a   :  { %v1131_v11 = vadd.f32 %v2966_v15, %v1130_v10  ;;  %v2034_v12 = vpop.f32.mrb[103].mxu0  ;;  %v1242_v13 = vmax.f32 %v1128_v8, 0.0 }
 0x33c   :  { %v1243_v14 = vmax.f32 %v1131_v11, 0.0 }
 0x33e   :  { %v1274_v16 = vpack.c.bf16 %v1243_v14, %v1242_v13 }
 0x33f   :  { %v1135_v17 = vpop.f32.mrb[104].mxu0 }
 0x340   :  { %v1136_v18 = vadd.f32 %v2966_v15, %v1135_v17  ;;  %v2037_v19 = vpop.f32.mrb[105].mxu0  ;;  %2116 = vmatmul.mubr.msk.bf16.gmra.mrb[96].mxu1 %vm361_vm2, %v1274_v16 }
 0x341   :  { %v1138_v27 = vpop.f32.mrb[106].mxu0  ;;  %2119 = vmatprep.mubr.msk.bf16.mxu1 %vm2298_vm0, %v2297_v3 }
 0x342   :  { %v1139_v20 = vadd.f32 %v2966_v15, %v1138_v27  ;;  %v2038_v21 = vpop.f32.mrb[107].mxu0  ;;  %v1244_v22 = vmax.f32 %v1136_v18, 0.0 }
 0x344   :  { %v1245_v23 = vmax.f32 %v1139_v20, 0.0 }
 0x346   :  { %v1275_v24 = vpack.c.bf16 %v1245_v23, %v1244_v22 }
 0x347   :  { %v1143_v25 = vpop.f32.mrb[108].mxu0 }
 0x348   :  { %v1144_v26 = vadd.f32 %v2966_v15, %v1143_v25  ;;  %v2041_v36 = vpop.f32.mrb[109].mxu0  ;;  %2120 = vmatmul.mubr.msk.bf16.gmra.mrb[100].mxu1 %vm361_vm2, %v1275_v24 }
 0x349   :  { %v1146_v28 = vpop.f32.mrb[110].mxu0  ;;  %2123 = vmatprep.mubr.msk.bf16.mxu1 %vm2298_vm0, %v2297_v3 }
 0x34a   :  { %v1147_v29 = vadd.f32 %v2966_v15, %v1146_v28  ;;  %v2042_v30 = vpop.f32.mrb[111].mxu0  ;;  %v1246_v31 = vmax.f32 %v1144_v26, 0.0 }
 0x34c   :  { %v1247_v32 = vmax.f32 %v1147_v29, 0.0 }
 0x34e   :  { %v1276_v33 = vpack.c.bf16 %v1247_v32, %v1246_v31 }
 0x34f   :  { %v1151_v34 = vpop.f32.mrb[112].mxu0 }
 0x350   :  { %v1152_v35 = vadd.f32 %v2966_v15, %v1151_v34  ;;  %v2045_v37 = vpop.f32.mrb[113].mxu0  ;;  %2124 = vmatmul.mubr.msk.bf16.gmra.mrb[104].mxu1 %vm361_vm2, %v1276_v33 }
 0x351   :  { %v1154_v38 = vpop.f32.mrb[114].mxu0  ;;  %2127 = vmatprep.mubr.msk.bf16.mxu1 %vm2298_vm0, %v2297_v3 }
 0x352   :  { %v1155_v39 = vadd.f32 %v2966_v15, %v1154_v38  ;;  %v2046_v40 = vpop.f32.mrb[115].mxu0  ;;  %v1248_v41 = vmax.f32 %v1152_v35, 0.0 }
 0x354   :  { %v1249_v42 = vmax.f32 %v1155_v39, 0.0 }
 0x356   :  { %v1277_v43 = vpack.c.bf16 %v1249_v42, %v1248_v41 }
 0x357   :  { %v1159_v44 = vpop.f32.mrb[116].mxu0 }
 0x358   :  { %v1160_v45 = vadd.f32 %v2966_v15, %v1159_v44  ;;  %v2049_v46 = vpop.f32.mrb[117].mxu0  ;;  %2128 = vmatmul.mubr.msk.bf16.gmra.mrb[108].mxu1 %vm361_vm2, %v1277_v43 }
 0x359   :  { %v1162_v47 = vpop.f32.mrb[118].mxu0  ;;  %2131 = vmatprep.mubr.msk.bf16.mxu1 %vm2298_vm0, %v2297_v3 }
 0x35a   :  { %v1163_v48 = vadd.f32 %v2966_v15, %v1162_v47  ;;  %v2050_v49 = vpop.f32.mrb[119].mxu0  ;;  %v1250_v50 = vmax.f32 %v1160_v45, 0.0 }
 0x35c   :  { %v1251_v51 = vmax.f32 %v1163_v48, 0.0 }
 0x35e   :  { %v1278_v52 = vpack.c.bf16 %v1251_v51, %v1250_v50 }
 0x35f   :  { %v1167_v53 = vpop.f32.mrb[120].mxu0 }
 0x360   :  { %v1168_v54 = vadd.f32 %v2966_v15, %v1167_v53  ;;  %v2053_v55 = vpop.f32.mrb[121].mxu0  ;;  %2132 = vmatmul.mubr.msk.bf16.gmra.mrb[112].mxu1 %vm361_vm2, %v1278_v52 }
 0x361   :  { %v1170_v56 = vpop.f32.mrb[122].mxu0  ;;  %2135 = vmatprep.mubr.msk.bf16.mxu1 %vm2298_vm0, %v2297_v3 }
 0x362   :  { %v1171_v57 = vadd.f32 %v2966_v15, %v1170_v56  ;;  %v2054_v58 = vpop.f32.mrb[123].mxu0  ;;  %v1252_v59 = vmax.f32 %v1168_v54, 0.0 }
 0x364   :  { %v1253_v60 = vmax.f32 %v1171_v57, 0.0 }
 0x366   :  { %v1279_v61 = vpack.c.bf16 %v1253_v60, %v1252_v59 }
 0x367   :  { %v1175_v62 = vpop.f32.mrb[124].mxu0 }
 0x368   :  { %v1176_v63 = vadd.f32 %v2966_v15, %v1175_v62  ;;  %v2057_v0 = vpop.f32.mrb[125].mxu0  ;;  %2136 = vmatmul.mubr.msk.bf16.gmra.mrb[116].mxu1 %vm361_vm2, %v1279_v61 }
 0x369   :  { %v1178_v1 = vpop.f32.mrb[126].mxu0  ;;  %2139 = vmatprep.mubr.msk.bf16.mxu1 %vm2298_vm0, %v2297_v3 }
 0x36a   :  { %v1179_v2 = vadd.f32 %v2966_v15, %v1178_v1  ;;  %v2058_v4 = vpop.f32.mrb[127].mxu0  ;;  %v1254_v5 = vmax.f32 %v1176_v63, 0.0  ;;  %v3062_v63 = vld [vmem:[%s3262_s9] ss:$0 sm:$0xff] }
 0x36c   :  { %v1255_v6 = vmax.f32 %v1179_v2, 0.0 }
 0x36e   :  { %v1280_v7 = vpack.c.bf16 %v1255_v6, %v1254_v5 }
 0x36f   :  { %v1183_v8 = vpop.f32.mrb[128].mxu0 }
 0x370   :  { %v1184_v9 = vadd.f32 %v2966_v15, %v1183_v8  ;;  %v2061_v10 = vpop.f32.mrb[129].mxu0  ;;  %2140 = vmatmul.mubr.msk.bf16.gmra.mrb[120].mxu1 %vm361_vm2, %v1280_v7 }
 0x371   :  { %v1186_v11 = vpop.f32.mrb[130].mxu0  ;;  %2143 = vmatprep.mubr.msk.bf16.mxu1 %vm2298_vm0, %v2297_v3 }
 0x372   :  { %v1187_v12 = vadd.f32 %v2966_v15, %v1186_v11  ;;  %v2062_v13 = vpop.f32.mrb[131].mxu0  ;;  %v1256_v14 = vmax.f32 %v1184_v9, 0.0 }
 0x374   :  { %v1257_v16 = vmax.f32 %v1187_v12, 0.0 }
 0x376   :  { %v1281_v17 = vpack.c.bf16 %v1257_v16, %v1256_v14 }
 0x377   :  { %v1191_v18 = vpop.f32.mrb[132].mxu0 }
 0x378   :  { %v1192_v19 = vadd.f32 %v2966_v15, %v1191_v18  ;;  %v2065_v27 = vpop.f32.mrb[133].mxu0  ;;  %2144 = vmatmul.mubr.msk.bf16.gmra.mrb[124].mxu1 %vm361_vm2, %v1281_v17 }
 0x379   :  { %v1194_v20 = vpop.f32.mrb[134].mxu0  ;;  %2147 = vmatprep.mubr.msk.bf16.mxu1 %vm2298_vm0, %v2297_v3 }
 0x37a   :  { %v1195_v21 = vadd.f32 %v2966_v15, %v1194_v20  ;;  %v2066_v22 = vpop.f32.mrb[135].mxu0  ;;  %v1258_v23 = vmax.f32 %v1192_v19, 0.0 }
 0x37c   :  { %v1259_v24 = vmax.f32 %v1195_v21, 0.0 }
 0x37e   :  { %v1282_v25 = vpack.c.bf16 %v1259_v24, %v1258_v23 }
 0x37f   :  { %v1199_v26 = vpop.f32.mrb[136].mxu0 }
 0x380   :  { %v1200_v36 = vadd.f32 %v2966_v15, %v1199_v26  ;;  %v2069_v28 = vpop.f32.mrb[137].mxu0  ;;  %2148 = vmatmul.mubr.msk.bf16.gmra.mrb[128].mxu1 %vm361_vm2, %v1282_v25 }
 0x381   :  { %v1202_v29 = vpop.f32.mrb[138].mxu0  ;;  %2151 = vmatprep.mubr.msk.bf16.mxu1 %vm2298_vm0, %v2297_v3 }
 0x382   :  { %v1203_v30 = vadd.f32 %v2966_v15, %v1202_v29  ;;  %v2070_v31 = vpop.f32.mrb[139].mxu0  ;;  %v1260_v32 = vmax.f32 %v1200_v36, 0.0 }
 0x384   :  { %v1261_v33 = vmax.f32 %v1203_v30, 0.0 }
 0x386   :  { %v1283_v34 = vpack.c.bf16 %v1261_v33, %v1260_v32 }
 0x387   :  { %v1207_v35 = vpop.f32.mrb[140].mxu0 }
 0x388   :  { %v1208_v37 = vadd.f32 %v2966_v15, %v1207_v35  ;;  %v2073_v38 = vpop.f32.mrb[141].mxu0  ;;  %2152 = vmatmul.mubr.msk.bf16.gmra.mrb[132].mxu1 %vm361_vm2, %v1283_v34 }
 0x389   :  { %v1210_v39 = vpop.f32.mrb[142].mxu0  ;;  %2155 = vmatprep.mubr.msk.bf16.mxu1 %vm2298_vm0, %v2297_v3 }
 0x38a   :  { %v1211_v40 = vadd.f32 %v2966_v15, %v1210_v39  ;;  %v2074_v41 = vpop.f32.mrb[143].mxu0  ;;  %v1262_v42 = vmax.f32 %v1208_v37, 0.0 }
 0x38c   :  { %v1263_v43 = vmax.f32 %v1211_v40, 0.0 }
 0x38e   :  { %v1284_v44 = vpack.c.bf16 %v1263_v43, %v1262_v42 }
 0x38f   :  { %v1215_v45 = vpop.f32.mrb[144].mxu0 }
 0x390   :  { %v1216_v46 = vadd.f32 %v2966_v15, %v1215_v45  ;;  %v2077_v47 = vpop.f32.mrb[145].mxu0  ;;  %2156 = vmatmul.mubr.msk.bf16.gmra.mrb[136].mxu1 %vm361_vm2, %v1284_v44 }
 0x391   :  { %v1218_v48 = vpop.f32.mrb[146].mxu0  ;;  %2159 = vmatprep.mubr.msk.bf16.mxu1 %vm2298_vm0, %v2297_v3 }
 0x392   :  { %v1219_v49 = vadd.f32 %v2966_v15, %v1218_v48  ;;  %v2078_v50 = vpop.f32.mrb[147].mxu0  ;;  %v1264_v51 = vmax.f32 %v1216_v46, 0.0 }
 0x394   :  { %v1265_v52 = vmax.f32 %v1219_v49, 0.0 }
 0x396   :  { %v1285_v53 = vpack.c.bf16 %v1265_v52, %v1264_v51 }
 0x397   :  { %v1223_v54 = vpop.f32.mrb[148].mxu0 }
 0x398   :  { %v1224_v55 = vadd.f32 %v2966_v15, %v1223_v54  ;;  %v2081_v56 = vpop.f32.mrb[149].mxu0  ;;  %2160 = vmatmul.mubr.msk.bf16.gmra.mrb[140].mxu1 %vm361_vm2, %v1285_v53 }
 0x399   :  { %v1226_v57 = vpop.f32.mrb[150].mxu0  ;;  %2163 = vmatprep.mubr.msk.bf16.mxu1 %vm2298_vm0, %v2297_v3 }
 0x39a   :  { %v1227_v58 = vadd.f32 %v2966_v15, %v1226_v57  ;;  %v2082_v59 = vpop.f32.mrb[151].mxu0  ;;  %v1266_v60 = vmax.f32 %v1224_v55, 0.0 }
 0x39c   :  { %v1267_v61 = vmax.f32 %v1227_v58, 0.0 }
 0x39e   :  { %v1286_v62 = vpack.c.bf16 %v1267_v61, %v1266_v60 }
 0x3a0   :  { %2164 = vmatmul.mubr.msk.bf16.gmra.mrb[144].mxu1 %vm361_vm2, %v1286_v62 }
 0x3e3   :  { %v1417_v0 = vpop.f32.mrb[152].mxu0 }
 0x3e4   :  { %v1418_v1 = vadd.f32 %v3062_v63, %v1417_v0  ;;  %v2093_v2 = vpop.f32.mrb[153].mxu0 }
 0x3e5   :  { %v1420_v4 = vpop.f32.mrb[154].mxu0 }
 0x3e6   :  { %v1568_v5 = vmax.f32 %v1418_v1, 0.0  ;;  %v1421_v3 = vadd.f32 %v3062_v63, %v1420_v4  ;;  %v2094_v15 = vpop.f32.mrb[155].mxu0 }
 0x3e8   :  { %1606 = vst.msk [vmem:[%s3263_s10] sm:$0xff] %vm264_vm1, %v1568_v5  ;;  %v1569_v6 = vmax.f32 %v1421_v3, 0.0 }
 0x3ea   :  { %1607 = vst.msk [vmem:[%s3263_s10 + $0x8] sm:$0xff] %vm264_vm1, %v1569_v6 }
 0x3eb   :  { %v1425_v7 = vpop.f32.mrb[76].mxu1 }
 0x3ec   :  { %v1426_v8 = vadd.f32 %v3062_v63, %v1425_v7  ;;  %v2097_v9 = vpop.f32.mrb[77].mxu1 }
 0x3ed   :  { %v1428_v10 = vpop.f32.mrb[78].mxu1 }
 0x3ee   :  { %v1570_v11 = vmax.f32 %v1426_v8, 0.0  ;;  %v1429_v12 = vadd.f32 %v3062_v63, %v1428_v10  ;;  %v2098_v13 = vpop.f32.mrb[79].mxu1 }
 0x3f0   :  { %1608 = vst.msk [vmem:[%s3263_s10 + $0x10] sm:$0xff] %vm264_vm1, %v1570_v11  ;;  %v1571_v14 = vmax.f32 %v1429_v12, 0.0 }
 0x3f2   :  { %1609 = vst.msk [vmem:[%s3263_s10 + $0x18] sm:$0xff] %vm264_vm1, %v1571_v14 }
 0x3f3   :  { %v1433_v16 = vpop.f32.mrb[80].mxu1 }
 0x3f4   :  { %v1434_v17 = vadd.f32 %v3062_v63, %v1433_v16  ;;  %v2101_v18 = vpop.f32.mrb[81].mxu1 }
 0x3f5   :  { %v1436_v19 = vpop.f32.mrb[82].mxu1 }
 0x3f6   :  { %v1572_v27 = vmax.f32 %v1434_v17, 0.0  ;;  %v1437_v20 = vadd.f32 %v3062_v63, %v1436_v19  ;;  %v2102_v21 = vpop.f32.mrb[83].mxu1 }
 0x3f8   :  { %1610 = vst.msk [vmem:[%s3263_s10 + $0x20] sm:$0xff] %vm264_vm1, %v1572_v27  ;;  %v1573_v22 = vmax.f32 %v1437_v20, 0.0 }
 0x3fa   :  { %1611 = vst.msk [vmem:[%s3263_s10 + $0x28] sm:$0xff] %vm264_vm1, %v1573_v22 }
 0x3fb   :  { %v1441_v23 = vpop.f32.mrb[84].mxu1 }
 0x3fc   :  { %v1442_v24 = vadd.f32 %v3062_v63, %v1441_v23  ;;  %v2105_v25 = vpop.f32.mrb[85].mxu1 }
 0x3fd   :  { %v1444_v26 = vpop.f32.mrb[86].mxu1 }
 0x3fe   :  { %v1574_v36 = vmax.f32 %v1442_v24, 0.0  ;;  %v1445_v28 = vadd.f32 %v3062_v63, %v1444_v26  ;;  %v2106_v29 = vpop.f32.mrb[87].mxu1 }
 0x400   :  { %1612 = vst.msk [vmem:[%s3263_s10 + $0x30] sm:$0xff] %vm264_vm1, %v1574_v36  ;;  %v1575_v30 = vmax.f32 %v1445_v28, 0.0 }
 0x402   :  { %1613 = vst.msk [vmem:[%s3263_s10 + $0x38] sm:$0xff] %vm264_vm1, %v1575_v30 }
 0x403   :  { %v1449_v31 = vpop.f32.mrb[88].mxu1 }
 0x404   :  { %v1450_v32 = vadd.f32 %v3062_v63, %v1449_v31  ;;  %v2109_v33 = vpop.f32.mrb[89].mxu1 }
 0x405   :  { %v1452_v34 = vpop.f32.mrb[90].mxu1 }
 0x406   :  { %v1576_v35 = vmax.f32 %v1450_v32, 0.0  ;;  %v1453_v37 = vadd.f32 %v3062_v63, %v1452_v34  ;;  %v2110_v38 = vpop.f32.mrb[91].mxu1 }
 0x408   :  { %1614 = vst.msk [vmem:[%s3263_s10 + $0x40] sm:$0xff] %vm264_vm1, %v1576_v35  ;;  %v1577_v39 = vmax.f32 %v1453_v37, 0.0 }
 0x40a   :  { %1615 = vst.msk [vmem:[%s3263_s10 + $0x48] sm:$0xff] %vm264_vm1, %v1577_v39 }
 0x40b   :  { %v1457_v40 = vpop.f32.mrb[92].mxu1 }
 0x40c   :  { %v1458_v41 = vadd.f32 %v3062_v63, %v1457_v40  ;;  %v2113_v42 = vpop.f32.mrb[93].mxu1 }
 0x40d   :  { %v1460_v43 = vpop.f32.mrb[94].mxu1 }
 0x40e   :  { %v1578_v44 = vmax.f32 %v1458_v41, 0.0  ;;  %v1461_v45 = vadd.f32 %v3062_v63, %v1460_v43  ;;  %v2114_v46 = vpop.f32.mrb[95].mxu1 }
 0x410   :  { %1616 = vst.msk [vmem:[%s3263_s10 + $0x50] sm:$0xff] %vm264_vm1, %v1578_v44  ;;  %v1579_v47 = vmax.f32 %v1461_v45, 0.0 }
 0x412   :  { %1617 = vst.msk [vmem:[%s3263_s10 + $0x58] sm:$0xff] %vm264_vm1, %v1579_v47 }
 0x413   :  { %v1465_v48 = vpop.f32.mrb[96].mxu1 }
 0x414   :  { %v1466_v49 = vadd.f32 %v3062_v63, %v1465_v48  ;;  %v2117_v50 = vpop.f32.mrb[97].mxu1 }
 0x415   :  { %v1468_v51 = vpop.f32.mrb[98].mxu1 }
 0x416   :  { %v1580_v52 = vmax.f32 %v1466_v49, 0.0  ;;  %v1469_v53 = vadd.f32 %v3062_v63, %v1468_v51  ;;  %v2118_v54 = vpop.f32.mrb[99].mxu1 }
 0x418   :  { %1618 = vst.msk [vmem:[%s3263_s10 + $0x60] sm:$0xff] %vm264_vm1, %v1580_v52  ;;  %v1581_v55 = vmax.f32 %v1469_v53, 0.0 }
 0x41a   :  { %1619 = vst.msk [vmem:[%s3263_s10 + $0x68] sm:$0xff] %vm264_vm1, %v1581_v55 }
 0x41b   :  { %v1473_v56 = vpop.f32.mrb[100].mxu1 }
 0x41c   :  { %v1474_v57 = vadd.f32 %v3062_v63, %v1473_v56  ;;  %v2121_v58 = vpop.f32.mrb[101].mxu1 }
 0x41d   :  { %v1476_v59 = vpop.f32.mrb[102].mxu1 }
 0x41e   :  { %v1582_v60 = vmax.f32 %v1474_v57, 0.0  ;;  %v1477_v61 = vadd.f32 %v3062_v63, %v1476_v59  ;;  %v2122_v62 = vpop.f32.mrb[103].mxu1 }
 0x420   :  { %1620 = vst.msk [vmem:[%s3263_s10 + $0x70] sm:$0xff] %vm264_vm1, %v1582_v60  ;;  %v1583_v0 = vmax.f32 %v1477_v61, 0.0 }
 0x422   :  { %1621 = vst.msk [vmem:[%s3263_s10 + $0x78] sm:$0xff] %vm264_vm1, %v1583_v0 }
 0x423   :  { %v1481_v1 = vpop.f32.mrb[104].mxu1 }
 0x424   :  { %v1482_v2 = vadd.f32 %v3062_v63, %v1481_v1  ;;  %v2125_v4 = vpop.f32.mrb[105].mxu1 }
 0x425   :  { %v1484_v5 = vpop.f32.mrb[106].mxu1 }
 0x426   :  { %v1584_v3 = vmax.f32 %v1482_v2, 0.0  ;;  %v1485_v15 = vadd.f32 %v3062_v63, %v1484_v5  ;;  %v2126_v6 = vpop.f32.mrb[107].mxu1 }
 0x428   :  { %1622 = vst.msk [vmem:[%s3263_s10 + $0x80] sm:$0xff] %vm264_vm1, %v1584_v3  ;;  %v1585_v7 = vmax.f32 %v1485_v15, 0.0 }
 0x42a   :  { %1623 = vst.msk [vmem:[%s3263_s10 + $0x88] sm:$0xff] %vm264_vm1, %v1585_v7 }
 0x42b   :  { %v1489_v8 = vpop.f32.mrb[108].mxu1 }
 0x42c   :  { %v1490_v9 = vadd.f32 %v3062_v63, %v1489_v8  ;;  %v2129_v10 = vpop.f32.mrb[109].mxu1 }
 0x42d   :  { %v1492_v11 = vpop.f32.mrb[110].mxu1 }
 0x42e   :  { %v1586_v12 = vmax.f32 %v1490_v9, 0.0  ;;  %v1493_v13 = vadd.f32 %v3062_v63, %v1492_v11  ;;  %v2130_v14 = vpop.f32.mrb[111].mxu1 }
 0x430   :  { %1624 = vst.msk [vmem:[%s3263_s10 + $0x90] sm:$0xff] %vm264_vm1, %v1586_v12  ;;  %v1587_v16 = vmax.f32 %v1493_v13, 0.0 }
 0x432   :  { %1625 = vst.msk [vmem:[%s3263_s10 + $0x98] sm:$0xff] %vm264_vm1, %v1587_v16 }
 0x433   :  { %v1497_v17 = vpop.f32.mrb[112].mxu1 }
 0x434   :  { %v1498_v18 = vadd.f32 %v3062_v63, %v1497_v17  ;;  %v2133_v19 = vpop.f32.mrb[113].mxu1 }
 0x435   :  { %v1500_v27 = vpop.f32.mrb[114].mxu1 }
 0x436   :  { %v1588_v20 = vmax.f32 %v1498_v18, 0.0  ;;  %v1501_v21 = vadd.f32 %v3062_v63, %v1500_v27  ;;  %v2134_v22 = vpop.f32.mrb[115].mxu1 }
 0x438   :  { %1626 = vst.msk [vmem:[%s3263_s10 + $0xa0] sm:$0xff] %vm264_vm1, %v1588_v20  ;;  %v1589_v23 = vmax.f32 %v1501_v21, 0.0 }
 0x43a   :  { %1627 = vst.msk [vmem:[%s3263_s10 + $0xa8] sm:$0xff] %vm264_vm1, %v1589_v23 }
 0x43b   :  { %v1505_v24 = vpop.f32.mrb[116].mxu1 }
 0x43c   :  { %v1506_v25 = vadd.f32 %v3062_v63, %v1505_v24  ;;  %v2137_v26 = vpop.f32.mrb[117].mxu1 }
 0x43d   :  { %v1508_v36 = vpop.f32.mrb[118].mxu1 }
 0x43e   :  { %v1590_v28 = vmax.f32 %v1506_v25, 0.0  ;;  %v1509_v29 = vadd.f32 %v3062_v63, %v1508_v36  ;;  %v2138_v30 = vpop.f32.mrb[119].mxu1 }
 0x440   :  { %1628 = vst.msk [vmem:[%s3263_s10 + $0xb0] sm:$0xff] %vm264_vm1, %v1590_v28  ;;  %v1591_v31 = vmax.f32 %v1509_v29, 0.0 }
 0x442   :  { %1629 = vst.msk [vmem:[%s3263_s10 + $0xb8] sm:$0xff] %vm264_vm1, %v1591_v31 }
 0x443   :  { %v1513_v32 = vpop.f32.mrb[120].mxu1 }
 0x444   :  { %v1514_v33 = vadd.f32 %v3062_v63, %v1513_v32  ;;  %v2141_v34 = vpop.f32.mrb[121].mxu1 }
 0x445   :  { %v1516_v35 = vpop.f32.mrb[122].mxu1 }
 0x446   :  { %v1592_v37 = vmax.f32 %v1514_v33, 0.0  ;;  %v1517_v38 = vadd.f32 %v3062_v63, %v1516_v35  ;;  %v2142_v39 = vpop.f32.mrb[123].mxu1 }
 0x448   :  { %1630 = vst.msk [vmem:[%s3263_s10 + $0xc0] sm:$0xff] %vm264_vm1, %v1592_v37  ;;  %v1593_v40 = vmax.f32 %v1517_v38, 0.0 }
 0x44a   :  { %1631 = vst.msk [vmem:[%s3263_s10 + $0xc8] sm:$0xff] %vm264_vm1, %v1593_v40 }
 0x44b   :  { %v1521_v41 = vpop.f32.mrb[124].mxu1 }
 0x44c   :  { %v1522_v42 = vadd.f32 %v3062_v63, %v1521_v41  ;;  %v2145_v43 = vpop.f32.mrb[125].mxu1 }
 0x44d   :  { %v1524_v44 = vpop.f32.mrb[126].mxu1 }
 0x44e   :  { %v1594_v45 = vmax.f32 %v1522_v42, 0.0  ;;  %v1525_v46 = vadd.f32 %v3062_v63, %v1524_v44  ;;  %v2146_v47 = vpop.f32.mrb[127].mxu1 }
 0x450   :  { %1632 = vst.msk [vmem:[%s3263_s10 + $0xd0] sm:$0xff] %vm264_vm1, %v1594_v45  ;;  %v1595_v48 = vmax.f32 %v1525_v46, 0.0 }
 0x452   :  { %1633 = vst.msk [vmem:[%s3263_s10 + $0xd8] sm:$0xff] %vm264_vm1, %v1595_v48 }
 0x453   :  { %v1529_v49 = vpop.f32.mrb[128].mxu1 }
 0x454   :  { %v1530_v50 = vadd.f32 %v3062_v63, %v1529_v49  ;;  %v2149_v51 = vpop.f32.mrb[129].mxu1 }
 0x455   :  { %v1532_v52 = vpop.f32.mrb[130].mxu1 }
 0x456   :  { %v1596_v53 = vmax.f32 %v1530_v50, 0.0  ;;  %v1533_v54 = vadd.f32 %v3062_v63, %v1532_v52  ;;  %v2150_v55 = vpop.f32.mrb[131].mxu1 }
 0x458   :  { %1634 = vst.msk [vmem:[%s3263_s10 + $0xe0] sm:$0xff] %vm264_vm1, %v1596_v53  ;;  %v1597_v56 = vmax.f32 %v1533_v54, 0.0 }
 0x45a   :  { %1635 = vst.msk [vmem:[%s3263_s10 + $0xe8] sm:$0xff] %vm264_vm1, %v1597_v56 }
 0x45b   :  { %v1537_v57 = vpop.f32.mrb[132].mxu1 }
 0x45c   :  { %v1538_v58 = vadd.f32 %v3062_v63, %v1537_v57  ;;  %v2153_v59 = vpop.f32.mrb[133].mxu1 }
 0x45d   :  { %v1540_v60 = vpop.f32.mrb[134].mxu1 }
 0x45e   :  { %v1598_v61 = vmax.f32 %v1538_v58, 0.0  ;;  %v1541_v62 = vadd.f32 %v3062_v63, %v1540_v60  ;;  %v2154_v0 = vpop.f32.mrb[135].mxu1 }
 0x460   :  { %1636 = vst.msk [vmem:[%s3263_s10 + $0xf0] sm:$0xff] %vm264_vm1, %v1598_v61  ;;  %v1599_v1 = vmax.f32 %v1541_v62, 0.0 }
 0x462   :  { %1637 = vst.msk [vmem:[%s3263_s10 + $0xf8] sm:$0xff] %vm264_vm1, %v1599_v1 }
 0x463   :  { %v1545_v2 = vpop.f32.mrb[136].mxu1 }
 0x464   :  { %v1546_v4 = vadd.f32 %v3062_v63, %v1545_v2  ;;  %v2157_v5 = vpop.f32.mrb[137].mxu1 }
 0x465   :  { %v1548_v3 = vpop.f32.mrb[138].mxu1 }
 0x466   :  { %v1600_v15 = vmax.f32 %v1546_v4, 0.0  ;;  %v1549_v6 = vadd.f32 %v3062_v63, %v1548_v3  ;;  %v2158_v7 = vpop.f32.mrb[139].mxu1 }
 0x468   :  { %1638 = vst.msk [vmem:[%s3263_s10 + $0x100] sm:$0xff] %vm264_vm1, %v1600_v15  ;;  %v1601_v8 = vmax.f32 %v1549_v6, 0.0 }
 0x46a   :  { %1639 = vst.msk [vmem:[%s3263_s10 + $0x108] sm:$0xff] %vm264_vm1, %v1601_v8 }
 0x46b   :  { %v1553_v9 = vpop.f32.mrb[140].mxu1 }
 0x46c   :  { %v1554_v10 = vadd.f32 %v3062_v63, %v1553_v9  ;;  %v2161_v11 = vpop.f32.mrb[141].mxu1 }
 0x46d   :  { %v1556_v12 = vpop.f32.mrb[142].mxu1 }
 0x46e   :  { %v1602_v13 = vmax.f32 %v1554_v10, 0.0  ;;  %v1557_v14 = vadd.f32 %v3062_v63, %v1556_v12  ;;  %v2162_v16 = vpop.f32.mrb[143].mxu1 }
 0x470   :  { %1640 = vst.msk [vmem:[%s3263_s10 + $0x110] sm:$0xff] %vm264_vm1, %v1602_v13  ;;  %v1603_v17 = vmax.f32 %v1557_v14, 0.0 }
 0x472   :  { %1641 = vst.msk [vmem:[%s3263_s10 + $0x118] sm:$0xff] %vm264_vm1, %v1603_v17 }
 0x473   :  { %v1561_v18 = vpop.f32.mrb[144].mxu1 }
 0x474   :  { %v1562_v19 = vadd.f32 %v3062_v63, %v1561_v18  ;;  %v2165_v27 = vpop.f32.mrb[145].mxu1 }
 0x475   :  { %v1564_v20 = vpop.f32.mrb[146].mxu1 }
 0x476   :  { %v1604_v21 = vmax.f32 %v1562_v19, 0.0  ;;  %v1565_v22 = vadd.f32 %v3062_v63, %v1564_v20  ;;  %v2166_v23 = vpop.f32.mrb[147].mxu1 }
 0x478   :  { %1642 = vst.msk [vmem:[%s3263_s10 + $0x120] sm:$0xff] %vm264_vm1, %v1604_v21  ;;  %v1605_v24 = vmax.f32 %v1565_v22, 0.0 }
 0x47a   :  { %1644 = vst.msk [vmem:[%s3263_s10 + $0x128] sm:$0xf] %vm1643_vm3, %v1605_v24 }

</bundles_post_ra>
